<compile_context>
chip_gen: v7x
topology: tpu7x:2x2x1
jax: 0.10.0
libtpu: 0.0.40
codegen_flags: <defaults>
</compile_context>

<pallas_src>
from math import prod

import jax
import jax.numpy as jnp
from jax.experimental import pallas as pl
from jax.experimental.pallas import tpu as pltpu


def _ceil_to(x, m):
    return ((x + m - 1) // m) * m


def _cdiv(a, b):
    return (a + b - 1) // b


def _choose_tile(M, per_lane_bytes, *, vmem_budget=12 << 20, max_tile=32768):
    """Pick (tm, grid) for the flattened-edge (lane) axis.

    - tm is bounded by a VMEM budget (double-buffered out tile + temporaries).
    - the number of tiles is picked BEFORE the tile size so padding stays a
      small sliver even when tm is large.
    - >= 2 grid steps whenever possible (v7x megacore), >= 4 for large M so
      the output DMA pipeline has steps to overlap.
    """
    M128 = _ceil_to(max(int(M), 1), 128)
    cap = (vmem_budget // per_lane_bytes) // 128 * 128
    cap = max(128, min(cap, max_tile))
    ntiles = _cdiv(M128, cap)                    # VMEM-driven lower bound
    if M128 >= 2 * 128:
        ntiles = max(ntiles, 2)                  # keep both TCs busy on v7x
    if M128 >= 4 * 2048:
        ntiles = max(ntiles, 4)                  # pipeline depth for large M
    tm = _ceil_to(_cdiv(M128, ntiles), 128)
    if tm >= 2048:
        tm = _ceil_to(tm, 512)                   # keep big tiles 512-aligned
    tm = min(tm, cap)
    grid = _cdiv(M128, tm)
    return tm, grid


def _rad_poly_trig_kernel(norms_ref, mask_ref, abc_ref, wt_ref, out_ref):
    n = norms_ref[...]                    # (1, tm)   flattened edges on lanes
    m = mask_ref[...]                     # (1, tm)
    abc = abc_ref[...]                    # (4, naug, 1): a, b, c, keep
    a, b, c, keep = abc[0], abc[1], abc[2], abc[3]

    cn = c * n                                              # (naug, tm)
    # Lorentzian basis: b * (1 + (c*r)^2)^-1 + a ; reciprocal on the EUP slot.
    rad = b * pl.reciprocal(1.0 + cn * cn, approx=True) + a
    # Edge mask; rows with keep==1 (the folded-bias constant-1 row) are never
    # masked, matching torch semantics where bias is added even at masked edges.
    rad = jnp.where(jnp.maximum(m, keep) > 0.0, rad, 0.0)

    # All L Linear layers + bias in ONE MXU pass:
    #   (L*2C, naug) @ (naug, tm) -> (L*2C, tm), lane-dense store.
    out_ref[...] = jnp.dot(wt_ref[...], rad,
                           preferred_element_type=jnp.float32
                           ).astype(out_ref.dtype)


def rad_poly_trig_apply(norms, edge_mask, params, *, num_channels,
                        out_dtype=jnp.float32):
    """mix=True ('cplx') path of RadPolyTrig.forward."""
    s = norms.shape
    M = int(prod(s))
    a, b, c, W, bias = params             # (1,2K)x3, (L,2K,2C), (L,2C)
    L, two_k, two_c = W.shape
    l2c = L * two_c
    assert two_c == 2 * num_channels
    f32 = jnp.float32

    # Augmented basis: one extra constant-1 row carries the bias through the
    # matmul; contraction dim padded to a multiple of 8 sublanes.
    naug = _ceil_to(two_k + 1, 8)
    a_aug = jnp.zeros((naug,), f32).at[:two_k].set(a.reshape(-1).astype(f32)
                                                   ).at[two_k].set(1.0)
    b_aug = jnp.zeros((naug,), f32).at[:two_k].set(b.reshape(-1).astype(f32))
    c_aug = jnp.zeros((naug,), f32).at[:two_k].set(c.reshape(-1).astype(f32))
    keep = jnp.zeros((naug,), f32).at[two_k:].set(1.0)   # rows immune to mask
    abc = jnp.stack([a_aug, b_aug, c_aug, keep], axis=0).reshape(4, naug, 1)

    # Fold all L Linear layers (weights + bias column) into one matrix.
    wt = jnp.transpose(W, (0, 2, 1)).reshape(l2c, two_k).astype(f32)
    wt_aug = (jnp.zeros((l2c, naug), f32)
              .at[:, :two_k].set(wt)
              .at[:, two_k].set(bias.reshape(l2c).astype(f32)))

    # Lane-tile size / grid from the VMEM budget.
    out_itemsize = jnp.dtype(out_dtype).itemsize
    per_lane = (2 * l2c * out_itemsize     # double-buffered output tile
                + 2 * naug * 4             # rad / cn temporaries
                + 2 * 2 * 4)               # double-buffered norms + mask
    tm, grid = _choose_tile(M, per_lane)
    M_pad = tm * grid
    pad = M_pad - M

    flat_norms = jnp.pad(norms.reshape(1, M).astype(f32), ((0, 0), (0, pad)))
    flat_mask = jnp.pad((edge_mask != 0).astype(f32).reshape(1, M),
                        ((0, 0), (0, pad)))

    out = pl.pallas_call(
        _rad_poly_trig_kernel,
        out_shape=jax.ShapeDtypeStruct((l2c, M_pad), out_dtype),
        grid_spec=pltpu.PrefetchScalarGridSpec(
            num_scalar_prefetch=0,
            grid=(grid,),
            in_specs=[
                pl.BlockSpec((1, tm), lambda i: (0, i)),           # norms
                pl.BlockSpec((1, tm), lambda i: (0, i)),           # mask
                pl.BlockSpec((4, naug, 1), lambda i: (0, 0, 0)),   # a,b,c,keep
                pl.BlockSpec((l2c, naug), lambda i: (0, 0)),       # W | bias
            ],
            out_specs=pl.BlockSpec((l2c, tm), lambda i: (0, i)),
        ),
        compiler_params=pltpu.CompilerParams(
            dimension_semantics=("parallel",),
            vmem_limit_bytes=32 * 1024 * 1024),
    )(flat_norms, flat_mask, abc, wt_aug)

    # ONE transpose of the whole slab (instead of L per-l transposes):
    #   (L*2C, M) -> (L, C, 2, M) -> (L, 2, M, C)
    # Per-l results are then free leading-axis slices + reshapes.
    out = out[:, :M].reshape(L, num_channels, 2, M)
    out = jnp.transpose(out, (0, 2, 3, 1))               # (L, 2, M, C)

    results = {}
    for l in range(L):
        results[(l, l)] = out[l].reshape((2,) + s + (num_channels,))
    return results


def init_radial_filters_params(key, max_zf, num_basis_fn, num_channels_out,
                               num_levels):
    """Deterministic synthetic init mirroring RadPolyTrig.__init__ shapes."""
    params = []
    for level in range(num_levels):
        key, ka, kb, kc, kw, kbi = jax.random.split(key, 6)
        two_k = 2 * num_basis_fn
        two_c = 2 * num_channels_out[level]
        L = max_zf[level] + 1                              # max_zf+1 Linear layers
        a = jax.random.normal(ka, (1, two_k), jnp.float32)
        b = jax.random.normal(kb, (1, two_k), jnp.float32)
        c = jax.random.normal(kc, (1, two_k), jnp.float32)
        bound = 1.0 / jnp.sqrt(jnp.float32(two_k))
        W = jax.random.uniform(kw, (L, two_k, two_c), jnp.float32, -bound, bound)
        bias = jax.random.uniform(kbi, (L, two_c), jnp.float32, -bound, bound)
        params.append((a, b, c, W, bias))
    return params


def radial_filters_forward(norms, base_mask, params_list, num_channels_out):
    """RadialFilters.forward: one RadPolyTrig evaluation per CG level."""
    # TODO(synk): levels could be fused into a single pallas_call (shared
    # norms/mask reads); kept separate for clarity since writes dominate.
    return [
        rad_poly_trig_apply(norms, base_mask, params,
                            num_channels=num_channels_out[i])
        for i, params in enumerate(params_list)
    ]


def _reference_level(norms, mask, params, num_channels):
    """Pure-JAX reference of the mix=True RadPolyTrig forward."""
    a, b, c, W, bias = params
    s = norms.shape
    n = norms[..., None]
    m = mask[..., None] > 0
    rad = jnp.where(m,
                    b.reshape(-1) / (1.0 + (c.reshape(-1) * n) ** 2)
                    + a.reshape(-1),
                    0.0)                                   # s + (2K,)
    out = {}
    axes = (len(s) + 1,) + tuple(range(len(s) + 1))
    for l in range(W.shape[0]):
        y = rad @ W[l] + bias[l]                           # s + (2C,)
        y = y.reshape(s + (num_channels, 2))
        out[(l, l)] = jnp.transpose(y, axes)
    return out


if __name__ == "__main__":
    # Small, module-consistent config:
    #   num_levels=2, per-level max_zf, num_basis_fn=8, per-level channels=4
    num_levels = 2
    max_zf = [2, 1]
    num_basis_fn = 8
    num_channels_out = [4, 4]

    key = jax.random.PRNGKey(0)
    kp, kn, km = jax.random.split(key, 3)

    params_list = init_radial_filters_params(
        kp, max_zf, num_basis_fn, num_channels_out, num_levels)

    # norms: pairwise distance matrix (batch=2, natoms=12, natoms=12)
    # -> M = 288 flattened edges, which exercises the multi-tile (grid=2) path.
    batch, natoms = 2, 12
    norms = jnp.abs(jax.random.normal(kn, (batch, natoms, natoms), jnp.float32))
    base_mask = (jax.random.uniform(km, (batch, natoms, natoms)) > 0.3
                 ).astype(jnp.float32)

    # One jit over all levels so the per-level pallas_calls share one launch.
    fwd = jax.jit(lambda n, m, p: radial_filters_forward(
        n, m, p, num_channels_out))
    outs = jax.block_until_ready(fwd(norms, base_mask, params_list))

    # Correctness check vs. the pure-JAX reference. Tolerance is widened from
    # 1e-5 to 2e-2 because the kernel uses the approximate EUP reciprocal
    # (pl.reciprocal(..., approx=True)); layout/folding bugs would produce O(1)
    # errors and are still caught.
    for level, level_out in enumerate(outs):
        ref = _reference_level(norms, base_mask, params_list[level],
                               num_channels_out[level])
        for l in range(max_zf[level] + 1):
            got = level_out[(l, l)]
            want = ref[(l, l)]
            assert got.shape == (2, batch, natoms, natoms,
                                 num_channels_out[level]), got.shape
            assert jnp.allclose(got, want, atol=2e-2, rtol=2e-2), (
                f"mismatch at level {level}, l={l}: "
                f"max err {float(jnp.max(jnp.abs(got - want)))}")

    # TODO(synk): GScalar container type is returned as a plain dict
    # {(l, l): array}; mix='real' / mix='none' branches are not exercised.
    print("KERNEL_OK")
</pallas_src>

<mosaic_0001>
module attributes {stable_mosaic.version = 11 : i64} {
  func.func @_rad_poly_trig_kernel(%arg0: i32, %arg1: memref<1x256xf32, #tpu.memory_space<vmem>>, %arg2: memref<1x256xf32, #tpu.memory_space<vmem>>, %arg3: memref<4x24x1xf32, #tpu.memory_space<vmem>>, %arg4: memref<16x24xf32, #tpu.memory_space<vmem>>, %arg5: memref<16x256xf32, #tpu.memory_space<vmem>>) attributes {dimension_semantics = [#tpu.dimension_semantics<parallel>], iteration_bounds = array<i64: 2>, scalar_prefetch = 0 : i64, scratch_operands = 0 : i64, tpu.core_type = #tpu.core_type<tc>, window_params = [{transform_indices = @transform_0, window_bounds = array<i64: 1, 256>}, {transform_indices = @transform_1, window_bounds = array<i64: 1, 256>}, {pipeline_mode = #tpu.pipeline_mode<synchronous>, transform_indices = @transform_2, window_bounds = array<i64: 4, 24, 1>}, {pipeline_mode = #tpu.pipeline_mode<synchronous>, transform_indices = @transform_3, window_bounds = array<i64: 16, 24>}, {transform_indices = @transform_4, window_bounds = array<i64: 16, 256>}]} {
    %c0 = arith.constant 0 : index
    %c0_0 = arith.constant 0 : index
    %0 = vector.load %arg1[%c0, %c0_0] : memref<1x256xf32, #tpu.memory_space<vmem>>, vector<1x256xf32>
    %c0_1 = arith.constant 0 : index
    %c0_2 = arith.constant 0 : index
    %1 = vector.load %arg2[%c0_1, %c0_2] : memref<1x256xf32, #tpu.memory_space<vmem>>, vector<1x256xf32>
    %c0_3 = arith.constant 0 : index
    %c0_4 = arith.constant 0 : index
    %c0_5 = arith.constant 0 : index
    %2 = vector.load %arg3[%c0_3, %c0_4, %c0_5] : memref<4x24x1xf32, #tpu.memory_space<vmem>>, vector<4x24x1xf32>
    %3 = vector.extract_strided_slice %2 {offsets = [0, 0, 0], sizes = [1, 24, 1], strides = [1, 1, 1]} : vector<4x24x1xf32> to vector<1x24x1xf32>
    %4 = vector.shape_cast %3 : vector<1x24x1xf32> to vector<24x1xf32>
    %5 = vector.extract_strided_slice %2 {offsets = [1, 0, 0], sizes = [1, 24, 1], strides = [1, 1, 1]} : vector<4x24x1xf32> to vector<1x24x1xf32>
    %6 = vector.shape_cast %5 : vector<1x24x1xf32> to vector<24x1xf32>
    %7 = vector.extract_strided_slice %2 {offsets = [2, 0, 0], sizes = [1, 24, 1], strides = [1, 1, 1]} : vector<4x24x1xf32> to vector<1x24x1xf32>
    %8 = vector.shape_cast %7 : vector<1x24x1xf32> to vector<24x1xf32>
    %9 = vector.extract_strided_slice %2 {offsets = [3, 0, 0], sizes = [1, 24, 1], strides = [1, 1, 1]} : vector<4x24x1xf32> to vector<1x24x1xf32>
    %10 = vector.shape_cast %9 : vector<1x24x1xf32> to vector<24x1xf32>
    %11 = vector.broadcast %8 : vector<24x1xf32> to vector<24x256xf32>
    %12 = vector.broadcast %0 : vector<1x256xf32> to vector<24x256xf32>
    %13 = arith.mulf %11, %12 : vector<24x256xf32>
    %14 = arith.mulf %13, %13 : vector<24x256xf32>
    %cst = arith.constant 1.000000e+00 : f32
    %15 = vector.broadcast %cst : f32 to vector<24x256xf32>
    %16 = arith.addf %15, %14 : vector<24x256xf32>
    %17 = tpu.reciprocal %16 {approx = true} : vector<24x256xf32> -> vector<24x256xf32>
    %18 = vector.broadcast %6 : vector<24x1xf32> to vector<24x256xf32>
    %19 = arith.mulf %18, %17 : vector<24x256xf32>
    %20 = vector.broadcast %4 : vector<24x1xf32> to vector<24x256xf32>
    %21 = arith.addf %19, %20 : vector<24x256xf32>
    %22 = vector.broadcast %1 : vector<1x256xf32> to vector<24x256xf32>
    %23 = vector.broadcast %10 : vector<24x1xf32> to vector<24x256xf32>
    %24 = arith.maximumf %22, %23 : vector<24x256xf32>
    %cst_6 = arith.constant 0.000000e+00 : f32
    %25 = vector.broadcast %cst_6 : f32 to vector<24x256xf32>
    %26 = arith.cmpf ogt, %24, %25 : vector<24x256xf32>
    %cst_7 = arith.constant 0.000000e+00 : f32
    %27 = vector.broadcast %cst_7 : f32 to vector<24x256xf32>
    %28 = arith.select %26, %21, %27 : vector<24x256xi1>, vector<24x256xf32>
    %c0_8 = arith.constant 0 : index
    %c0_9 = arith.constant 0 : index
    %29 = vector.load %arg4[%c0_8, %c0_9] : memref<16x24xf32, #tpu.memory_space<vmem>>, vector<16x24xf32>
    %cst_10 = arith.constant dense<0.000000e+00> : vector<16x256xf32>
    %30 = tpu.matmul %29, %28, %cst_10 {dimension_numbers = #tpu.dot_dimension_numbers<[1], [0], [0], [1], [0, 0, 1, 1], [], []>} : vector<16x24xf32>, vector<24x256xf32>, vector<16x256xf32> -> vector<16x256xf32>
    %c0_11 = arith.constant 0 : index
    %c0_12 = arith.constant 0 : index
    %31 = vector.load %arg5[%c0_11, %c0_12] : memref<16x256xf32, #tpu.memory_space<vmem>>, vector<16x256xf32>
    tpu.vector_store %arg5[%c0_11, %c0_12], %30 {strides = array<i32>} : memref<16x256xf32, #tpu.memory_space<vmem>>, vector<16x256xf32>,
    return
  }
  func.func @transform_0(%arg0: i32) -> (i32, i32) {
    %c0_i32 = arith.constant 0 : i32
    %c0_i32_0 = arith.constant 0 : i32
    return %c0_i32, %arg0 : i32, i32
  }
  func.func @transform_1(%arg0: i32) -> (i32, i32) {
    %c0_i32 = arith.constant 0 : i32
    %c0_i32_0 = arith.constant 0 : i32
    return %c0_i32, %arg0 : i32, i32
  }
  func.func @transform_2(%arg0: i32) -> (i32, i32, i32) {
    %c0_i32 = arith.constant 0 : i32
    %c0_i32_0 = arith.constant 0 : i32
    %c0_i32_1 = arith.constant 0 : i32
    %c0_i32_2 = arith.constant 0 : i32
    return %c0_i32, %c0_i32_0, %c0_i32_1 : i32, i32, i32
  }
  func.func @transform_3(%arg0: i32) -> (i32, i32) {
    %c0_i32 = arith.constant 0 : i32
    %c0_i32_0 = arith.constant 0 : i32
    %c0_i32_1 = arith.constant 0 : i32
    return %c0_i32, %c0_i32_0 : i32, i32
  }
  func.func @transform_4(%arg0: i32) -> (i32, i32) {
    %c0_i32 = arith.constant 0 : i32
    %c0_i32_0 = arith.constant 0 : i32
    return %c0_i32, %arg0 : i32, i32
  }
}

module attributes {stable_mosaic.version = 11 : i64} {
  func.func @_rad_poly_trig_kernel(%arg0: i32, %arg1: memref<1x256xf32, #tpu.memory_space<vmem>>, %arg2: memref<1x256xf32, #tpu.memory_space<vmem>>, %arg3: memref<4x24x1xf32, #tpu.memory_space<vmem>>, %arg4: memref<24x24xf32, #tpu.memory_space<vmem>>, %arg5: memref<24x256xf32, #tpu.memory_space<vmem>>) attributes {dimension_semantics = [#tpu.dimension_semantics<parallel>], iteration_bounds = array<i64: 2>, scalar_prefetch = 0 : i64, scratch_operands = 0 : i64, tpu.core_type = #tpu.core_type<tc>, window_params = [{transform_indices = @transform_0, window_bounds = array<i64: 1, 256>}, {transform_indices = @transform_1, window_bounds = array<i64: 1, 256>}, {pipeline_mode = #tpu.pipeline_mode<synchronous>, transform_indices = @transform_2, window_bounds = array<i64: 4, 24, 1>}, {pipeline_mode = #tpu.pipeline_mode<synchronous>, transform_indices = @transform_3, window_bounds = array<i64: 24, 24>}, {transform_indices = @transform_4, window_bounds = array<i64: 24, 256>}]} {
    %c0 = arith.constant 0 : index
    %c0_0 = arith.constant 0 : index
    %0 = vector.load %arg1[%c0, %c0_0] : memref<1x256xf32, #tpu.memory_space<vmem>>, vector<1x256xf32>
    %c0_1 = arith.constant 0 : index
    %c0_2 = arith.constant 0 : index
    %1 = vector.load %arg2[%c0_1, %c0_2] : memref<1x256xf32, #tpu.memory_space<vmem>>, vector<1x256xf32>
    %c0_3 = arith.constant 0 : index
    %c0_4 = arith.constant 0 : index
    %c0_5 = arith.constant 0 : index
    %2 = vector.load %arg3[%c0_3, %c0_4, %c0_5] : memref<4x24x1xf32, #tpu.memory_space<vmem>>, vector<4x24x1xf32>
    %3 = vector.extract_strided_slice %2 {offsets = [0, 0, 0], sizes = [1, 24, 1], strides = [1, 1, 1]} : vector<4x24x1xf32> to vector<1x24x1xf32>
    %4 = vector.shape_cast %3 : vector<1x24x1xf32> to vector<24x1xf32>
    %5 = vector.extract_strided_slice %2 {offsets = [1, 0, 0], sizes = [1, 24, 1], strides = [1, 1, 1]} : vector<4x24x1xf32> to vector<1x24x1xf32>
    %6 = vector.shape_cast %5 : vector<1x24x1xf32> to vector<24x1xf32>
    %7 = vector.extract_strided_slice %2 {offsets = [2, 0, 0], sizes = [1, 24, 1], strides = [1, 1, 1]} : vector<4x24x1xf32> to vector<1x24x1xf32>
    %8 = vector.shape_cast %7 : vector<1x24x1xf32> to vector<24x1xf32>
    %9 = vector.extract_strided_slice %2 {offsets = [3, 0, 0], sizes = [1, 24, 1], strides = [1, 1, 1]} : vector<4x24x1xf32> to vector<1x24x1xf32>
    %10 = vector.shape_cast %9 : vector<1x24x1xf32> to vector<24x1xf32>
    %11 = vector.broadcast %8 : vector<24x1xf32> to vector<24x256xf32>
    %12 = vector.broadcast %0 : vector<1x256xf32> to vector<24x256xf32>
    %13 = arith.mulf %11, %12 : vector<24x256xf32>
    %14 = arith.mulf %13, %13 : vector<24x256xf32>
    %cst = arith.constant 1.000000e+00 : f32
    %15 = vector.broadcast %cst : f32 to vector<24x256xf32>
    %16 = arith.addf %15, %14 : vector<24x256xf32>
    %17 = tpu.reciprocal %16 {approx = true} : vector<24x256xf32> -> vector<24x256xf32>
    %18 = vector.broadcast %6 : vector<24x1xf32> to vector<24x256xf32>
    %19 = arith.mulf %18, %17 : vector<24x256xf32>
    %20 = vector.broadcast %4 : vector<24x1xf32> to vector<24x256xf32>
    %21 = arith.addf %19, %20 : vector<24x256xf32>
    %22 = vector.broadcast %1 : vector<1x256xf32> to vector<24x256xf32>
    %23 = vector.broadcast %10 : vector<24x1xf32> to vector<24x256xf32>
    %24 = arith.maximumf %22, %23 : vector<24x256xf32>
    %cst_6 = arith.constant 0.000000e+00 : f32
    %25 = vector.broadcast %cst_6 : f32 to vector<24x256xf32>
    %26 = arith.cmpf ogt, %24, %25 : vector<24x256xf32>
    %cst_7 = arith.constant 0.000000e+00 : f32
    %27 = vector.broadcast %cst_7 : f32 to vector<24x256xf32>
    %28 = arith.select %26, %21, %27 : vector<24x256xi1>, vector<24x256xf32>
    %c0_8 = arith.constant 0 : index
    %c0_9 = arith.constant 0 : index
    %29 = vector.load %arg4[%c0_8, %c0_9] : memref<24x24xf32, #tpu.memory_space<vmem>>, vector<24x24xf32>
    %cst_10 = arith.constant dense<0.000000e+00> : vector<24x256xf32>
    %30 = tpu.matmul %29, %28, %cst_10 {dimension_numbers = #tpu.dot_dimension_numbers<[1], [0], [0], [1], [0, 0, 1, 1], [], []>} : vector<24x24xf32>, vector<24x256xf32>, vector<24x256xf32> -> vector<24x256xf32>
    %c0_11 = arith.constant 0 : index
    %c0_12 = arith.constant 0 : index
    %31 = vector.load %arg5[%c0_11, %c0_12] : memref<24x256xf32, #tpu.memory_space<vmem>>, vector<24x256xf32>
    tpu.vector_store %arg5[%c0_11, %c0_12], %30 {strides = array<i32>} : memref<24x256xf32, #tpu.memory_space<vmem>>, vector<24x256xf32>,
    return
  }
  func.func @transform_0(%arg0: i32) -> (i32, i32) {
    %c0_i32 = arith.constant 0 : i32
    %c0_i32_0 = arith.constant 0 : i32
    return %c0_i32, %arg0 : i32, i32
  }
  func.func @transform_1(%arg0: i32) -> (i32, i32) {
    %c0_i32 = arith.constant 0 : i32
    %c0_i32_0 = arith.constant 0 : i32
    return %c0_i32, %arg0 : i32, i32
  }
  func.func @transform_2(%arg0: i32) -> (i32, i32, i32) {
    %c0_i32 = arith.constant 0 : i32
    %c0_i32_0 = arith.constant 0 : i32
    %c0_i32_1 = arith.constant 0 : i32
    %c0_i32_2 = arith.constant 0 : i32
    return %c0_i32, %c0_i32_0, %c0_i32_1 : i32, i32, i32
  }
  func.func @transform_3(%arg0: i32) -> (i32, i32) {
    %c0_i32 = arith.constant 0 : i32
    %c0_i32_0 = arith.constant 0 : i32
    %c0_i32_1 = arith.constant 0 : i32
    return %c0_i32, %c0_i32_0 : i32, i32
  }
  func.func @transform_4(%arg0: i32) -> (i32, i32) {
    %c0_i32 = arith.constant 0 : i32
    %c0_i32_0 = arith.constant 0 : i32
    return %c0_i32, %arg0 : i32, i32
  }
}

</mosaic_0001>

<bundles_post_ra>
// kernel: squeeze.7
= control target key start
LH: loop header
LB: loop body
LE: loop exit
PB: predicated region body
PF: predicated region fallthrough
CT: control target
= control target key end

     0   :  { %vm54_vm0 = vcmask 1047556   ;;  %vm577_vm1 = vcmask 982016   ;;  %s905_s18 = smov 124   ;;  %vm627_vm2 = vcmask 1014784   ;;  %s906_s19 = smov 8   ;;  %vm31_vm3 = vcmask 97280   ;;  %s1812_s0 = inlined_call_operand.vmem [shape: f32[1,2,288,4], index: 0, kind: input, shape index: {}]   ;;  %s1813_s1 = inlined_call_operand.vmem [shape: f32[2,2,12,12,4], index: 1, kind: output, shape index: {}]  }
   0x1   :  { %v671_v0 = vld [vmem:[%s1812_s0 + $0xc] sm:$0xf]  ;;  %v28_v1 = vld [vmem:[%s1812_s0] sm:$0xf]  ;;  %v670_v2 = vld [vmem:[%s1812_s0 + $0x10] sm:$0xf] }
   0x2   :  { %18 = vst [vmem:[#allocation0 + $0x18] sm:$0xf] %v671_v0  ;;  %29 = vst [vmem:[#allocation0] sm:$0xf] %v28_v1  ;;  %v673_v3 = vld [vmem:[%s1812_s0 + $0x4] sm:$0xf] }
   0x3   :  { %13 = vst [vmem:[#allocation0 + $0x20] sm:$0xf] %v670_v2  ;;  %27 = vst [vmem:[#allocation0 + $0x8] sm:$0xf] %v673_v3  ;;  %v669_v4 = vld [vmem:[%s1812_s0 + $0x14] sm:$0xf] }
   0x4   :  { %v672_v5 = vld [vmem:[%s1812_s0 + $0x8] sm:$0xf]  ;;  %8 = vst [vmem:[#allocation0 + $0x28] sm:$0xf] %v669_v4  ;;  %s904_s0 = smov 116   ;;  %s907_s20 = smov 120  }
   0x5   :  { %23 = vst [vmem:[#allocation0 + $0x10] sm:$0xf] %v672_v5  ;;  %s908_s21 = smov 4   ;;  %s909_s22 = smov 112   ;;  %vm581_vm4 = vcmask 64512   ;;  %vm598_vm5 = vcmask 97344  }
   0x6   :  { %s910_s23 = smov 108   ;;  %s911_s24 = smov 104   ;;  %vm631_vm6 = vcmask 31744   ;;  %vm648_vm7 = vcmask 97312  }
   0x7   :  { %s912_s25 = smov 100   ;;  %s913_s26 = smov 92  }
   0x8   :  { %s914_s27 = smov 88   ;;  %s915_s28 = smov 80  }
   0x9   :  { %v100_v6 = vld [vmem:[#allocation0] sm:$0xf]   ;;  %v102_v7 = vld [vmem:[#allocation0 + $0x14] sm:$0xf0]   ;;  %s916_s29 = smov 76   ;;  %s917_s30 = smov 68  }
   0xa   :  { %v566_v8 = vld [vmem:[#allocation0] sm:$0xf]   ;;  %v104_v9 = vsel %vm54_vm0, %v102_v7, %v100_v6  ;;  %v568_v10 = vld [vmem:[#allocation0 + $0x14] sm:$0xf0]   ;;  %v572_v11 = vld [vmem:[#allocation0 + $0x8] sm:$0xf]  }
   0xb   :  { %v574_v12 = vld [vmem:[#allocation0 + $0x1c] sm:$0xf0]   ;;  %105 = vrot.lane.b32.xlu0 %v104_v9, %s904_s0  ;;  %v570_v13 = vsel %vm54_vm0, %v568_v10, %v566_v8  ;;  %v51_v15 = vld [vmem:[#allocation0 + $0x8] sm:$0xf]   ;;  %v176_v35 = vld [vmem:[#allocation0 + $0x14] sm:$0xf0]  }
   0xc   :  { %v576_v14 = vsel %vm54_vm0, %v574_v12, %v572_v11  ;;  %v53_v16 = vld [vmem:[#allocation0 + $0x1c] sm:$0xf0]   ;;  %v616_v17 = vld [vmem:[#allocation0 + $0x8] sm:$0xf]   ;;  %v622_v21 = vld [vmem:[#allocation0 + $0x10] sm:$0xf]  }
   0xd   :  { %v578_v18 = vsel %vm577_vm1, %v576_v14, %v570_v13  ;;  %v55_v19 = vsel %vm54_vm0, %v53_v16, %v51_v15  ;;  %v618_v20 = vld [vmem:[#allocation0 + $0x1c] sm:$0xf0]   ;;  %v624_v22 = vld [vmem:[#allocation0 + $0x24] sm:$0xf0]   ;;  %v76_v25 = vld [vmem:[#allocation0 + $0x10] sm:$0xf]  }
   0xe   :  { %56 = vrot.lane.b32.xlu1 %v55_v19, %s905_s18  ;;  %v620_v23 = vsel %vm54_vm0, %v618_v20, %v616_v17  ;;  %v626_v24 = vsel %vm54_vm0, %v624_v22, %v622_v21  ;;  %v78_v26 = vld [vmem:[#allocation0 + $0x24] sm:$0xf0]   ;;  %v127_v29 = vld [vmem:[#allocation0 + $0x1c] sm:$0xf0]   ;;  %v150_v31 = vld [vmem:[#allocation0 + $0x10] sm:$0xf]  }
   0xf   :  { %v80_v27 = vsel %vm54_vm0, %v78_v26, %v76_v25  ;;  %579 = vrot.lane.b32.xlu0 %v578_v18, %s906_s19  ;;  %v125_v28 = vld [vmem:[#allocation0 + $0x8] sm:$0xf]   ;;  %v628_v30 = vsel %vm627_vm2, %v626_v24, %v620_v23  ;;  %v174_v34 = vld [vmem:[#allocation0] sm:$0xf]   ;;  %v225_v41 = vld [vmem:[#allocation0 + $0x14] sm:$0xf0]  }
  0x10   :  { %v152_v32 = vld [vmem:[#allocation0 + $0x24] sm:$0xf0]   ;;  %v129_v33 = vsel %vm54_vm0, %v127_v29, %v125_v28  ;;  %v201_v38 = vld [vmem:[#allocation0 + $0x1c] sm:$0xf0]   ;;  %v178_v39 = vsel %vm54_vm0, %v176_v35, %v174_v34  ;;  %v274_v47 = vld [vmem:[#allocation0 + $0x14] sm:$0xf0]  }
  0x11   :  { %v154_v36 = vsel %vm54_vm0, %v152_v32, %v150_v31  ;;  %v199_v37 = vld [vmem:[#allocation0 + $0x8] sm:$0xf]   ;;  %v223_v40 = vld [vmem:[#allocation0] sm:$0xf]   ;;  %v323_v53 = vld [vmem:[#allocation0 + $0x14] sm:$0xf0]  }
  0x12   :  { %81 = vrot.lane.b32.xlu1 %v80_v27, %s907_s20  ;;  %v203_v42 = vsel %vm54_vm0, %v201_v38, %v199_v37  ;;  %v248_v43 = vld [vmem:[#allocation0 + $0x8] sm:$0xf]   ;;  %v250_v44 = vld [vmem:[#allocation0 + $0x1c] sm:$0xf0]   ;;  %v227_v45 = vsel %vm54_vm0, %v225_v41, %v223_v40  ;;  %v372_v59 = vld [vmem:[#allocation0 + $0x14] sm:$0xf0]  }
  0x13   :  { %629 = vrot.lane.b32.xlu0 %v628_v30, %s908_s21  ;;  %v272_v46 = vld [vmem:[#allocation0] sm:$0xf]   ;;  %v252_v48 = vsel %vm54_vm0, %v250_v44, %v248_v43  ;;  %v297_v49 = vld [vmem:[#allocation0 + $0x8] sm:$0xf]   ;;  %s918_s2 = smov 64   ;;  %s919_s3 = smov 56  }
  0x14   :  { %v299_v50 = vld [vmem:[#allocation0 + $0x1c] sm:$0xf0]   ;;  %v276_v51 = vsel %vm54_vm0, %v274_v47, %v272_v46  ;;  %v346_v55 = vld [vmem:[#allocation0 + $0x8] sm:$0xf]   ;;  %v421_v1 = vld [vmem:[#allocation0 + $0x14] sm:$0xf0]  }
  0x15   :  { %v321_v52 = vld [vmem:[#allocation0] sm:$0xf]   ;;  %v301_v54 = vsel %vm54_vm0, %v299_v50, %v297_v49  ;;  %v395_v61 = vld [vmem:[#allocation0 + $0x8] sm:$0xf]   ;;  %v40_v6 = vld [vmem:[#allocation0 + $0x18] sm:$0xf]  }
  0x16   :  { %130 = vrot.lane.b32.xlu1 %v129_v33, %s909_s22  ;;  %v348_v56 = vld [vmem:[#allocation0 + $0x1c] sm:$0xf0]   ;;  %v325_v57 = vsel %vm54_vm0, %v323_v53, %v321_v52  ;;  %v444_v3 = vld [vmem:[#allocation0 + $0x8] sm:$0xf]   ;;  %677 = vst.msk [vmem:[%s1813_s1 + $0x80] sm:$0x1] %vm31_vm3, %v40_v6  }
  0x17   :  { %155 = vrot.lane.b32.xlu0 %v154_v36, %s910_s23  ;;  %v370_v58 = vld [vmem:[#allocation0] sm:$0xf]   ;;  %v350_v60 = vsel %vm54_vm0, %v348_v56, %v346_v55  ;;  %678 = vst.msk [vmem:[%s1813_s1 + $0x9f] sm:$0x2] %vm31_vm3, %v40_v6   ;;  %679 = vst.msk [vmem:[%s1813_s1 + $0xbe] sm:$0x4] %vm31_vm3, %v40_v6  }
  0x18   :  { %v397_v62 = vld [vmem:[#allocation0 + $0x1c] sm:$0xf0]   ;;  %v374_v63 = vsel %vm54_vm0, %v372_v59, %v370_v58  ;;  %680 = vst.msk [vmem:[%s1813_s1 + $0xdd] sm:$0x8] %vm31_vm3, %v40_v6   ;;  %s920_s19 = smov 52   ;;  %s921_s20 = smov 44  }
  0x19   :  { %v419_v0 = vld [vmem:[#allocation0] sm:$0xf]   ;;  %v399_v2 = vsel %vm54_vm0, %v397_v62, %v395_v61  ;;  %v470_v9 = vld [vmem:[#allocation0 + $0x14] sm:$0xf0]   ;;  %v493_v11 = vld [vmem:[#allocation0 + $0x8] sm:$0xf]  }
  0x1a   :  { %179 = vrot.lane.b32.xlu1 %v178_v39, %s911_s24  ;;  %v446_v4 = vld [vmem:[#allocation0 + $0x1c] sm:$0xf0]   ;;  %v423_v7 = vsel %vm54_vm0, %v421_v1, %v419_v0  ;;  %s922_s21 = smov 40   ;;  %v519_v15 = vld [vmem:[#allocation0 + $0x14] sm:$0xf0]   ;;  %s923_s22 = smov 32  }
  0x1b   :  { %204 = vrot.lane.b32.xlu0 %v203_v42, %s912_s25  ;;  %v30_v5 = vld [vmem:[#allocation0] sm:$0xf]   ;;  %v448_v10 = vsel %vm54_vm0, %v446_v4, %v444_v3  ;;  %v542_v17 = vld [vmem:[#allocation0 + $0x8] sm:$0xf]   ;;  %s924_s23 = smov 28   ;;  %s925_s24 = smov 20  }
  0x1c   :  { %32 = vst.msk [vmem:[%s1813_s1] sm:$0x1] %vm31_vm3, %v30_v5   ;;  %674 = vst.msk [vmem:[%s1813_s1 + $0x1f] sm:$0x2] %vm31_vm3, %v30_v5   ;;  %v468_v8 = vld [vmem:[#allocation0] sm:$0xf]  }
  0x1d   :  { %675 = vst.msk [vmem:[%s1813_s1 + $0x3e] sm:$0x4] %vm31_vm3, %v30_v5   ;;  %676 = vst.msk [vmem:[%s1813_s1 + $0x5d] sm:$0x8] %vm31_vm3, %v30_v5   ;;  %v495_v12 = vld [vmem:[#allocation0 + $0x1c] sm:$0xf0]   ;;  %v472_v13 = vsel %vm54_vm0, %v470_v9, %v468_v8 }
  0x1e   :  { %228 = vrot.lane.b32.xlu1 %v227_v45, %s913_s26  ;;  %v517_v14 = vld [vmem:[#allocation0] sm:$0xf]   ;;  %v497_v16 = vsel %vm54_vm0, %v495_v12, %v493_v11  ;;  %s926_s25 = smov 16  }
  0x1f   :  { %253 = vrot.lane.b32.xlu0 %v252_v48, %s914_s27  ;;  %v544_v18 = vld [vmem:[#allocation0 + $0x1c] sm:$0xf0]   ;;  %v521_v19 = vsel %vm54_vm0, %v519_v15, %v517_v14 }
  0x20   :  { %v546_v20 = vsel %vm54_vm0, %v544_v18, %v542_v17 }
  0x22   :  { %277 = vrot.lane.b32.xlu1 %v276_v51, %s915_s28 }
  0x23   :  { %302 = vrot.lane.b32.xlu0 %v301_v54, %s916_s29 }
  0x26   :  { %326 = vrot.lane.b32.xlu1 %v325_v57, %s917_s30 }
  0x27   :  { %351 = vrot.lane.b32.xlu0 %v350_v60, %s918_s2 }
  0x2a   :  { %375 = vrot.lane.b32.xlu1 %v374_v63, %s919_s3 }
  0x2b   :  { %400 = vrot.lane.b32.xlu0 %v399_v2, %s920_s19 }
  0x2e   :  { %424 = vrot.lane.b32.xlu1 %v423_v7, %s921_s20 }
  0x2f   :  { %449 = vrot.lane.b32.xlu0 %v448_v10, %s922_s21 }
  0x32   :  { %473 = vrot.lane.b32.xlu1 %v472_v13, %s923_s22 }
  0x33   :  { %498 = vrot.lane.b32.xlu0 %v497_v16, %s924_s23 }
  0x36   :  { %522 = vrot.lane.b32.xlu1 %v521_v19, %s925_s24 }
  0x37   :  { %547 = vrot.lane.b32.xlu0 %v546_v20, %s926_s25 }
  0x7d   :  { %v106_v21 = vpop.permute.xlu0 %105  }
  0x7e   :  { %697 = vst.msk [vmem:[%s1813_s1 + $0x1] sm:$0x1] %vm31_vm3, %v106_v21   ;;  %698 = vst.msk [vmem:[%s1813_s1 + $0x20] sm:$0x2] %vm31_vm3, %v106_v21  }
  0x7f   :  { %699 = vst.msk [vmem:[%s1813_s1 + $0x3f] sm:$0x4] %vm31_vm3, %v106_v21   ;;  %700 = vst.msk [vmem:[%s1813_s1 + $0x5e] sm:$0x8] %vm31_vm3, %v106_v21  }
  0x80   :  { %701 = vst.msk [vmem:[%s1813_s1 + $0x7d] sm:$0x10] %vm31_vm3, %v106_v21   ;;  %702 = vst.msk [vmem:[%s1813_s1 + $0x9c] sm:$0x20] %vm31_vm3, %v106_v21   ;;  %v57_v22 = vpop.permute.xlu1 %56  }
  0x81   :  { %703 = vst.msk [vmem:[%s1813_s1 + $0xbb] sm:$0x40] %vm31_vm3, %v106_v21   ;;  %704 = vst.msk [vmem:[%s1813_s1 + $0xda] sm:$0x80] %vm31_vm3, %v106_v21   ;;  %v580_v23 = vpop.permute.xlu0 %579  }
  0x82   :  { %681 = vst.msk [vmem:[%s1813_s1 + $0xb] sm:$0x1] %vm31_vm3, %v57_v22   ;;  %682 = vst.msk [vmem:[%s1813_s1 + $0x2a] sm:$0x2] %vm31_vm3, %v57_v22  }
  0x83   :  { %683 = vst.msk [vmem:[%s1813_s1 + $0x49] sm:$0x4] %vm31_vm3, %v57_v22   ;;  %684 = vst.msk [vmem:[%s1813_s1 + $0x68] sm:$0x8] %vm31_vm3, %v57_v22  }
  0x84   :  { %685 = vst.msk [vmem:[%s1813_s1 + $0x87] sm:$0x10] %vm31_vm3, %v57_v22   ;;  %686 = vst.msk [vmem:[%s1813_s1 + $0xa6] sm:$0x20] %vm31_vm3, %v57_v22   ;;  %v82_v24 = vpop.permute.xlu1 %81  }
  0x85   :  { %687 = vst.msk [vmem:[%s1813_s1 + $0xc5] sm:$0x40] %vm31_vm3, %v57_v22   ;;  %688 = vst.msk [vmem:[%s1813_s1 + $0xe4] sm:$0x80] %vm31_vm3, %v57_v22   ;;  %v630_v25 = vpop.permute.xlu0 %629  }
  0x86   :  { %849 = vst.msk [vmem:[%s1813_s1 + $0xa] sm:$0x1] %vm581_vm4, %v580_v23   ;;  %850 = vst.msk [vmem:[%s1813_s1 + $0x29] sm:$0x2] %vm581_vm4, %v580_v23  }
  0x87   :  { %851 = vst.msk [vmem:[%s1813_s1 + $0x48] sm:$0x4] %vm581_vm4, %v580_v23   ;;  %852 = vst.msk [vmem:[%s1813_s1 + $0x67] sm:$0x8] %vm581_vm4, %v580_v23  }
  0x88   :  { %853 = vst.msk [vmem:[%s1813_s1 + $0x86] sm:$0x10] %vm581_vm4, %v580_v23   ;;  %854 = vst.msk [vmem:[%s1813_s1 + $0xa5] sm:$0x20] %vm581_vm4, %v580_v23   ;;  %v131_v26 = vpop.permute.xlu1 %130  }
  0x89   :  { %855 = vst.msk [vmem:[%s1813_s1 + $0xc4] sm:$0x40] %vm581_vm4, %v580_v23   ;;  %856 = vst.msk [vmem:[%s1813_s1 + $0xe3] sm:$0x80] %vm581_vm4, %v580_v23   ;;  %v156_v27 = vpop.permute.xlu0 %155  }
  0x8a   :  { %857 = vst.msk [vmem:[%s1813_s1 + $0xa] sm:$0x1] %vm598_vm5, %v580_v23   ;;  %858 = vst.msk [vmem:[%s1813_s1 + $0x29] sm:$0x2] %vm598_vm5, %v580_v23  }
  0x8b   :  { %859 = vst.msk [vmem:[%s1813_s1 + $0x48] sm:$0x4] %vm598_vm5, %v580_v23   ;;  %860 = vst.msk [vmem:[%s1813_s1 + $0x67] sm:$0x8] %vm598_vm5, %v580_v23  }
  0x8c   :  { %861 = vst.msk [vmem:[%s1813_s1 + $0x86] sm:$0x10] %vm598_vm5, %v580_v23   ;;  %862 = vst.msk [vmem:[%s1813_s1 + $0xa5] sm:$0x20] %vm598_vm5, %v580_v23   ;;  %v180_v28 = vpop.permute.xlu1 %179  }
  0x8d   :  { %863 = vst.msk [vmem:[%s1813_s1 + $0xc4] sm:$0x40] %vm598_vm5, %v580_v23   ;;  %864 = vst.msk [vmem:[%s1813_s1 + $0xe3] sm:$0x80] %vm598_vm5, %v580_v23   ;;  %v205_v29 = vpop.permute.xlu0 %204  }
  0x8e   :  { %689 = vst.msk [vmem:[%s1813_s1 + $0x1a] sm:$0x1] %vm31_vm3, %v82_v24   ;;  %690 = vst.msk [vmem:[%s1813_s1 + $0x39] sm:$0x2] %vm31_vm3, %v82_v24  }
  0x8f   :  { %691 = vst.msk [vmem:[%s1813_s1 + $0x58] sm:$0x4] %vm31_vm3, %v82_v24   ;;  %692 = vst.msk [vmem:[%s1813_s1 + $0x77] sm:$0x8] %vm31_vm3, %v82_v24  }
  0x90   :  { %693 = vst.msk [vmem:[%s1813_s1 + $0x96] sm:$0x10] %vm31_vm3, %v82_v24   ;;  %694 = vst.msk [vmem:[%s1813_s1 + $0xb5] sm:$0x20] %vm31_vm3, %v82_v24   ;;  %v229_v30 = vpop.permute.xlu1 %228  }
  0x91   :  { %695 = vst.msk [vmem:[%s1813_s1 + $0xd4] sm:$0x40] %vm31_vm3, %v82_v24   ;;  %696 = vst.msk [vmem:[%s1813_s1 + $0xf3] sm:$0x80] %vm31_vm3, %v82_v24   ;;  %v254_v31 = vpop.permute.xlu0 %253  }
  0x92   :  { %865 = vst.msk [vmem:[%s1813_s1 + $0x19] sm:$0x1] %vm631_vm6, %v630_v25   ;;  %866 = vst.msk [vmem:[%s1813_s1 + $0x38] sm:$0x2] %vm631_vm6, %v630_v25  }
  0x93   :  { %867 = vst.msk [vmem:[%s1813_s1 + $0x57] sm:$0x4] %vm631_vm6, %v630_v25   ;;  %868 = vst.msk [vmem:[%s1813_s1 + $0x76] sm:$0x8] %vm631_vm6, %v630_v25  }
  0x94   :  { %869 = vst.msk [vmem:[%s1813_s1 + $0x95] sm:$0x10] %vm631_vm6, %v630_v25   ;;  %870 = vst.msk [vmem:[%s1813_s1 + $0xb4] sm:$0x20] %vm631_vm6, %v630_v25   ;;  %v278_v32 = vpop.permute.xlu1 %277  }
  0x95   :  { %871 = vst.msk [vmem:[%s1813_s1 + $0xd3] sm:$0x40] %vm631_vm6, %v630_v25   ;;  %872 = vst.msk [vmem:[%s1813_s1 + $0xf2] sm:$0x80] %vm631_vm6, %v630_v25   ;;  %v303_v33 = vpop.permute.xlu0 %302  }
  0x96   :  { %873 = vst.msk [vmem:[%s1813_s1 + $0x19] sm:$0x1] %vm648_vm7, %v630_v25   ;;  %874 = vst.msk [vmem:[%s1813_s1 + $0x38] sm:$0x2] %vm648_vm7, %v630_v25  }
  0x97   :  { %875 = vst.msk [vmem:[%s1813_s1 + $0x57] sm:$0x4] %vm648_vm7, %v630_v25   ;;  %876 = vst.msk [vmem:[%s1813_s1 + $0x76] sm:$0x8] %vm648_vm7, %v630_v25  }
  0x98   :  { %877 = vst.msk [vmem:[%s1813_s1 + $0x95] sm:$0x10] %vm648_vm7, %v630_v25   ;;  %878 = vst.msk [vmem:[%s1813_s1 + $0xb4] sm:$0x20] %vm648_vm7, %v630_v25   ;;  %v327_v34 = vpop.permute.xlu1 %326  }
  0x99   :  { %879 = vst.msk [vmem:[%s1813_s1 + $0xd3] sm:$0x40] %vm648_vm7, %v630_v25   ;;  %880 = vst.msk [vmem:[%s1813_s1 + $0xf2] sm:$0x80] %vm648_vm7, %v630_v25   ;;  %v352_v35 = vpop.permute.xlu0 %351  }
  0x9a   :  { %705 = vst.msk [vmem:[%s1813_s1 + $0x10] sm:$0x1] %vm31_vm3, %v131_v26   ;;  %706 = vst.msk [vmem:[%s1813_s1 + $0x2f] sm:$0x2] %vm31_vm3, %v131_v26  }
  0x9b   :  { %707 = vst.msk [vmem:[%s1813_s1 + $0x4e] sm:$0x4] %vm31_vm3, %v131_v26   ;;  %708 = vst.msk [vmem:[%s1813_s1 + $0x6d] sm:$0x8] %vm31_vm3, %v131_v26  }
  0x9c   :  { %709 = vst.msk [vmem:[%s1813_s1 + $0x8c] sm:$0x10] %vm31_vm3, %v131_v26   ;;  %710 = vst.msk [vmem:[%s1813_s1 + $0xab] sm:$0x20] %vm31_vm3, %v131_v26   ;;  %v376_v36 = vpop.permute.xlu1 %375  }
  0x9d   :  { %711 = vst.msk [vmem:[%s1813_s1 + $0xca] sm:$0x40] %vm31_vm3, %v131_v26   ;;  %712 = vst.msk [vmem:[%s1813_s1 + $0xe9] sm:$0x80] %vm31_vm3, %v131_v26   ;;  %v401_v37 = vpop.permute.xlu0 %400  }
  0x9e   :  { %713 = vst.msk [vmem:[%s1813_s1 + $0x1b] sm:$0x1] %vm31_vm3, %v156_v27   ;;  %714 = vst.msk [vmem:[%s1813_s1 + $0x3a] sm:$0x2] %vm31_vm3, %v156_v27  }
  0x9f   :  { %715 = vst.msk [vmem:[%s1813_s1 + $0x59] sm:$0x4] %vm31_vm3, %v156_v27   ;;  %716 = vst.msk [vmem:[%s1813_s1 + $0x78] sm:$0x8] %vm31_vm3, %v156_v27  }
  0xa0   :  { %717 = vst.msk [vmem:[%s1813_s1 + $0x97] sm:$0x10] %vm31_vm3, %v156_v27   ;;  %718 = vst.msk [vmem:[%s1813_s1 + $0xb6] sm:$0x20] %vm31_vm3, %v156_v27   ;;  %v425_v38 = vpop.permute.xlu1 %424  }
  0xa1   :  { %719 = vst.msk [vmem:[%s1813_s1 + $0xd5] sm:$0x40] %vm31_vm3, %v156_v27   ;;  %720 = vst.msk [vmem:[%s1813_s1 + $0xf4] sm:$0x80] %vm31_vm3, %v156_v27   ;;  %v450_v39 = vpop.permute.xlu0 %449  }
  0xa2   :  { %721 = vst.msk [vmem:[%s1813_s1 + $0x2] sm:$0x1] %vm31_vm3, %v180_v28   ;;  %722 = vst.msk [vmem:[%s1813_s1 + $0x21] sm:$0x2] %vm31_vm3, %v180_v28  }
  0xa3   :  { %723 = vst.msk [vmem:[%s1813_s1 + $0x40] sm:$0x4] %vm31_vm3, %v180_v28   ;;  %724 = vst.msk [vmem:[%s1813_s1 + $0x5f] sm:$0x8] %vm31_vm3, %v180_v28  }
  0xa4   :  { %725 = vst.msk [vmem:[%s1813_s1 + $0x7e] sm:$0x10] %vm31_vm3, %v180_v28   ;;  %726 = vst.msk [vmem:[%s1813_s1 + $0x9d] sm:$0x20] %vm31_vm3, %v180_v28   ;;  %v474_v40 = vpop.permute.xlu1 %473  }
  0xa5   :  { %727 = vst.msk [vmem:[%s1813_s1 + $0xbc] sm:$0x40] %vm31_vm3, %v180_v28   ;;  %728 = vst.msk [vmem:[%s1813_s1 + $0xdb] sm:$0x80] %vm31_vm3, %v180_v28   ;;  %v499_v41 = vpop.permute.xlu0 %498  }
  0xa6   :  { %729 = vst.msk [vmem:[%s1813_s1 + $0x11] sm:$0x1] %vm31_vm3, %v205_v29   ;;  %730 = vst.msk [vmem:[%s1813_s1 + $0x30] sm:$0x2] %vm31_vm3, %v205_v29  }
  0xa7   :  { %731 = vst.msk [vmem:[%s1813_s1 + $0x4f] sm:$0x4] %vm31_vm3, %v205_v29   ;;  %732 = vst.msk [vmem:[%s1813_s1 + $0x6e] sm:$0x8] %vm31_vm3, %v205_v29  }
  0xa8   :  { %733 = vst.msk [vmem:[%s1813_s1 + $0x8d] sm:$0x10] %vm31_vm3, %v205_v29   ;;  %734 = vst.msk [vmem:[%s1813_s1 + $0xac] sm:$0x20] %vm31_vm3, %v205_v29   ;;  %v523_v42 = vpop.permute.xlu1 %522  }
  0xa9   :  { %735 = vst.msk [vmem:[%s1813_s1 + $0xcb] sm:$0x40] %vm31_vm3, %v205_v29   ;;  %736 = vst.msk [vmem:[%s1813_s1 + $0xea] sm:$0x80] %vm31_vm3, %v205_v29   ;;  %v548_v43 = vpop.permute.xlu0 %547  }
  0xaa   :  { %737 = vst.msk [vmem:[%s1813_s1 + $0x3] sm:$0x1] %vm31_vm3, %v229_v30   ;;  %738 = vst.msk [vmem:[%s1813_s1 + $0x22] sm:$0x2] %vm31_vm3, %v229_v30  }
  0xab   :  { %739 = vst.msk [vmem:[%s1813_s1 + $0x41] sm:$0x4] %vm31_vm3, %v229_v30   ;;  %740 = vst.msk [vmem:[%s1813_s1 + $0x60] sm:$0x8] %vm31_vm3, %v229_v30  }
  0xac   :  { %741 = vst.msk [vmem:[%s1813_s1 + $0x7f] sm:$0x10] %vm31_vm3, %v229_v30   ;;  %742 = vst.msk [vmem:[%s1813_s1 + $0x9e] sm:$0x20] %vm31_vm3, %v229_v30  }
  0xad   :  { %743 = vst.msk [vmem:[%s1813_s1 + $0xbd] sm:$0x40] %vm31_vm3, %v229_v30   ;;  %744 = vst.msk [vmem:[%s1813_s1 + $0xdc] sm:$0x80] %vm31_vm3, %v229_v30  }
  0xae   :  { %745 = vst.msk [vmem:[%s1813_s1 + $0x12] sm:$0x1] %vm31_vm3, %v254_v31   ;;  %746 = vst.msk [vmem:[%s1813_s1 + $0x31] sm:$0x2] %vm31_vm3, %v254_v31  }
  0xaf   :  { %747 = vst.msk [vmem:[%s1813_s1 + $0x50] sm:$0x4] %vm31_vm3, %v254_v31   ;;  %748 = vst.msk [vmem:[%s1813_s1 + $0x6f] sm:$0x8] %vm31_vm3, %v254_v31  }
  0xb0   :  { %749 = vst.msk [vmem:[%s1813_s1 + $0x8e] sm:$0x10] %vm31_vm3, %v254_v31   ;;  %750 = vst.msk [vmem:[%s1813_s1 + $0xad] sm:$0x20] %vm31_vm3, %v254_v31  }
  0xb1   :  { %751 = vst.msk [vmem:[%s1813_s1 + $0xcc] sm:$0x40] %vm31_vm3, %v254_v31   ;;  %752 = vst.msk [vmem:[%s1813_s1 + $0xeb] sm:$0x80] %vm31_vm3, %v254_v31  }
  0xb2   :  { %753 = vst.msk [vmem:[%s1813_s1 + $0x4] sm:$0x1] %vm31_vm3, %v278_v32   ;;  %754 = vst.msk [vmem:[%s1813_s1 + $0x23] sm:$0x2] %vm31_vm3, %v278_v32  }
  0xb3   :  { %755 = vst.msk [vmem:[%s1813_s1 + $0x42] sm:$0x4] %vm31_vm3, %v278_v32   ;;  %756 = vst.msk [vmem:[%s1813_s1 + $0x61] sm:$0x8] %vm31_vm3, %v278_v32  }
  0xb4   :  { %757 = vst.msk [vmem:[%s1813_s1 + $0x80] sm:$0x10] %vm31_vm3, %v278_v32   ;;  %758 = vst.msk [vmem:[%s1813_s1 + $0x9f] sm:$0x20] %vm31_vm3, %v278_v32  }
  0xb5   :  { %759 = vst.msk [vmem:[%s1813_s1 + $0xbe] sm:$0x40] %vm31_vm3, %v278_v32   ;;  %760 = vst.msk [vmem:[%s1813_s1 + $0xdd] sm:$0x80] %vm31_vm3, %v278_v32  }
  0xb6   :  { %761 = vst.msk [vmem:[%s1813_s1 + $0x13] sm:$0x1] %vm31_vm3, %v303_v33   ;;  %762 = vst.msk [vmem:[%s1813_s1 + $0x32] sm:$0x2] %vm31_vm3, %v303_v33  }
  0xb7   :  { %763 = vst.msk [vmem:[%s1813_s1 + $0x51] sm:$0x4] %vm31_vm3, %v303_v33   ;;  %764 = vst.msk [vmem:[%s1813_s1 + $0x70] sm:$0x8] %vm31_vm3, %v303_v33  }
  0xb8   :  { %765 = vst.msk [vmem:[%s1813_s1 + $0x8f] sm:$0x10] %vm31_vm3, %v303_v33   ;;  %766 = vst.msk [vmem:[%s1813_s1 + $0xae] sm:$0x20] %vm31_vm3, %v303_v33  }
  0xb9   :  { %767 = vst.msk [vmem:[%s1813_s1 + $0xcd] sm:$0x40] %vm31_vm3, %v303_v33   ;;  %768 = vst.msk [vmem:[%s1813_s1 + $0xec] sm:$0x80] %vm31_vm3, %v303_v33  }
  0xba   :  { %769 = vst.msk [vmem:[%s1813_s1 + $0x5] sm:$0x1] %vm31_vm3, %v327_v34   ;;  %770 = vst.msk [vmem:[%s1813_s1 + $0x24] sm:$0x2] %vm31_vm3, %v327_v34  }
  0xbb   :  { %771 = vst.msk [vmem:[%s1813_s1 + $0x43] sm:$0x4] %vm31_vm3, %v327_v34   ;;  %772 = vst.msk [vmem:[%s1813_s1 + $0x62] sm:$0x8] %vm31_vm3, %v327_v34  }
  0xbc   :  { %773 = vst.msk [vmem:[%s1813_s1 + $0x81] sm:$0x10] %vm31_vm3, %v327_v34   ;;  %774 = vst.msk [vmem:[%s1813_s1 + $0xa0] sm:$0x20] %vm31_vm3, %v327_v34  }
  0xbd   :  { %775 = vst.msk [vmem:[%s1813_s1 + $0xbf] sm:$0x40] %vm31_vm3, %v327_v34   ;;  %776 = vst.msk [vmem:[%s1813_s1 + $0xde] sm:$0x80] %vm31_vm3, %v327_v34  }
  0xbe   :  { %777 = vst.msk [vmem:[%s1813_s1 + $0x14] sm:$0x1] %vm31_vm3, %v352_v35   ;;  %778 = vst.msk [vmem:[%s1813_s1 + $0x33] sm:$0x2] %vm31_vm3, %v352_v35  }
  0xbf   :  { %779 = vst.msk [vmem:[%s1813_s1 + $0x52] sm:$0x4] %vm31_vm3, %v352_v35   ;;  %780 = vst.msk [vmem:[%s1813_s1 + $0x71] sm:$0x8] %vm31_vm3, %v352_v35  }
  0xc0   :  { %781 = vst.msk [vmem:[%s1813_s1 + $0x90] sm:$0x10] %vm31_vm3, %v352_v35   ;;  %782 = vst.msk [vmem:[%s1813_s1 + $0xaf] sm:$0x20] %vm31_vm3, %v352_v35  }
  0xc1   :  { %783 = vst.msk [vmem:[%s1813_s1 + $0xce] sm:$0x40] %vm31_vm3, %v352_v35   ;;  %784 = vst.msk [vmem:[%s1813_s1 + $0xed] sm:$0x80] %vm31_vm3, %v352_v35  }
  0xc2   :  { %785 = vst.msk [vmem:[%s1813_s1 + $0x6] sm:$0x1] %vm31_vm3, %v376_v36   ;;  %786 = vst.msk [vmem:[%s1813_s1 + $0x25] sm:$0x2] %vm31_vm3, %v376_v36  }
  0xc3   :  { %787 = vst.msk [vmem:[%s1813_s1 + $0x44] sm:$0x4] %vm31_vm3, %v376_v36   ;;  %788 = vst.msk [vmem:[%s1813_s1 + $0x63] sm:$0x8] %vm31_vm3, %v376_v36  }
  0xc4   :  { %789 = vst.msk [vmem:[%s1813_s1 + $0x82] sm:$0x10] %vm31_vm3, %v376_v36   ;;  %790 = vst.msk [vmem:[%s1813_s1 + $0xa1] sm:$0x20] %vm31_vm3, %v376_v36  }
  0xc5   :  { %791 = vst.msk [vmem:[%s1813_s1 + $0xc0] sm:$0x40] %vm31_vm3, %v376_v36   ;;  %792 = vst.msk [vmem:[%s1813_s1 + $0xdf] sm:$0x80] %vm31_vm3, %v376_v36  }
  0xc6   :  { %793 = vst.msk [vmem:[%s1813_s1 + $0x15] sm:$0x1] %vm31_vm3, %v401_v37   ;;  %794 = vst.msk [vmem:[%s1813_s1 + $0x34] sm:$0x2] %vm31_vm3, %v401_v37  }
  0xc7   :  { %795 = vst.msk [vmem:[%s1813_s1 + $0x53] sm:$0x4] %vm31_vm3, %v401_v37   ;;  %796 = vst.msk [vmem:[%s1813_s1 + $0x72] sm:$0x8] %vm31_vm3, %v401_v37  }
  0xc8   :  { %797 = vst.msk [vmem:[%s1813_s1 + $0x91] sm:$0x10] %vm31_vm3, %v401_v37   ;;  %798 = vst.msk [vmem:[%s1813_s1 + $0xb0] sm:$0x20] %vm31_vm3, %v401_v37  }
  0xc9   :  { %799 = vst.msk [vmem:[%s1813_s1 + $0xcf] sm:$0x40] %vm31_vm3, %v401_v37   ;;  %800 = vst.msk [vmem:[%s1813_s1 + $0xee] sm:$0x80] %vm31_vm3, %v401_v37  }
  0xca   :  { %801 = vst.msk [vmem:[%s1813_s1 + $0x7] sm:$0x1] %vm31_vm3, %v425_v38   ;;  %802 = vst.msk [vmem:[%s1813_s1 + $0x26] sm:$0x2] %vm31_vm3, %v425_v38  }
  0xcb   :  { %803 = vst.msk [vmem:[%s1813_s1 + $0x45] sm:$0x4] %vm31_vm3, %v425_v38   ;;  %804 = vst.msk [vmem:[%s1813_s1 + $0x64] sm:$0x8] %vm31_vm3, %v425_v38  }
  0xcc   :  { %805 = vst.msk [vmem:[%s1813_s1 + $0x83] sm:$0x10] %vm31_vm3, %v425_v38   ;;  %806 = vst.msk [vmem:[%s1813_s1 + $0xa2] sm:$0x20] %vm31_vm3, %v425_v38  }
  0xcd   :  { %807 = vst.msk [vmem:[%s1813_s1 + $0xc1] sm:$0x40] %vm31_vm3, %v425_v38   ;;  %808 = vst.msk [vmem:[%s1813_s1 + $0xe0] sm:$0x80] %vm31_vm3, %v425_v38  }
  0xce   :  { %809 = vst.msk [vmem:[%s1813_s1 + $0x16] sm:$0x1] %vm31_vm3, %v450_v39   ;;  %810 = vst.msk [vmem:[%s1813_s1 + $0x35] sm:$0x2] %vm31_vm3, %v450_v39  }
  0xcf   :  { %811 = vst.msk [vmem:[%s1813_s1 + $0x54] sm:$0x4] %vm31_vm3, %v450_v39   ;;  %812 = vst.msk [vmem:[%s1813_s1 + $0x73] sm:$0x8] %vm31_vm3, %v450_v39  }
  0xd0   :  { %813 = vst.msk [vmem:[%s1813_s1 + $0x92] sm:$0x10] %vm31_vm3, %v450_v39   ;;  %814 = vst.msk [vmem:[%s1813_s1 + $0xb1] sm:$0x20] %vm31_vm3, %v450_v39  }
  0xd1   :  { %815 = vst.msk [vmem:[%s1813_s1 + $0xd0] sm:$0x40] %vm31_vm3, %v450_v39   ;;  %816 = vst.msk [vmem:[%s1813_s1 + $0xef] sm:$0x80] %vm31_vm3, %v450_v39  }
  0xd2   :  { %817 = vst.msk [vmem:[%s1813_s1 + $0x8] sm:$0x1] %vm31_vm3, %v474_v40   ;;  %818 = vst.msk [vmem:[%s1813_s1 + $0x27] sm:$0x2] %vm31_vm3, %v474_v40  }
  0xd3   :  { %819 = vst.msk [vmem:[%s1813_s1 + $0x46] sm:$0x4] %vm31_vm3, %v474_v40   ;;  %820 = vst.msk [vmem:[%s1813_s1 + $0x65] sm:$0x8] %vm31_vm3, %v474_v40  }
  0xd4   :  { %821 = vst.msk [vmem:[%s1813_s1 + $0x84] sm:$0x10] %vm31_vm3, %v474_v40   ;;  %822 = vst.msk [vmem:[%s1813_s1 + $0xa3] sm:$0x20] %vm31_vm3, %v474_v40  }
  0xd5   :  { %823 = vst.msk [vmem:[%s1813_s1 + $0xc2] sm:$0x40] %vm31_vm3, %v474_v40   ;;  %824 = vst.msk [vmem:[%s1813_s1 + $0xe1] sm:$0x80] %vm31_vm3, %v474_v40  }
  0xd6   :  { %825 = vst.msk [vmem:[%s1813_s1 + $0x17] sm:$0x1] %vm31_vm3, %v499_v41   ;;  %826 = vst.msk [vmem:[%s1813_s1 + $0x36] sm:$0x2] %vm31_vm3, %v499_v41  }
  0xd7   :  { %827 = vst.msk [vmem:[%s1813_s1 + $0x55] sm:$0x4] %vm31_vm3, %v499_v41   ;;  %828 = vst.msk [vmem:[%s1813_s1 + $0x74] sm:$0x8] %vm31_vm3, %v499_v41  }
  0xd8   :  { %829 = vst.msk [vmem:[%s1813_s1 + $0x93] sm:$0x10] %vm31_vm3, %v499_v41   ;;  %830 = vst.msk [vmem:[%s1813_s1 + $0xb2] sm:$0x20] %vm31_vm3, %v499_v41  }
  0xd9   :  { %831 = vst.msk [vmem:[%s1813_s1 + $0xd1] sm:$0x40] %vm31_vm3, %v499_v41   ;;  %832 = vst.msk [vmem:[%s1813_s1 + $0xf0] sm:$0x80] %vm31_vm3, %v499_v41  }
  0xda   :  { %833 = vst.msk [vmem:[%s1813_s1 + $0x9] sm:$0x1] %vm31_vm3, %v523_v42   ;;  %834 = vst.msk [vmem:[%s1813_s1 + $0x28] sm:$0x2] %vm31_vm3, %v523_v42  }
  0xdb   :  { %835 = vst.msk [vmem:[%s1813_s1 + $0x47] sm:$0x4] %vm31_vm3, %v523_v42   ;;  %836 = vst.msk [vmem:[%s1813_s1 + $0x66] sm:$0x8] %vm31_vm3, %v523_v42  }
  0xdc   :  { %837 = vst.msk [vmem:[%s1813_s1 + $0x85] sm:$0x10] %vm31_vm3, %v523_v42   ;;  %838 = vst.msk [vmem:[%s1813_s1 + $0xa4] sm:$0x20] %vm31_vm3, %v523_v42  }
  0xdd   :  { %839 = vst.msk [vmem:[%s1813_s1 + $0xc3] sm:$0x40] %vm31_vm3, %v523_v42   ;;  %840 = vst.msk [vmem:[%s1813_s1 + $0xe2] sm:$0x80] %vm31_vm3, %v523_v42  }
  0xde   :  { %841 = vst.msk [vmem:[%s1813_s1 + $0x18] sm:$0x1] %vm31_vm3, %v548_v43   ;;  %842 = vst.msk [vmem:[%s1813_s1 + $0x37] sm:$0x2] %vm31_vm3, %v548_v43  }
  0xdf   :  { %843 = vst.msk [vmem:[%s1813_s1 + $0x56] sm:$0x4] %vm31_vm3, %v548_v43   ;;  %844 = vst.msk [vmem:[%s1813_s1 + $0x75] sm:$0x8] %vm31_vm3, %v548_v43  }
  0xe0   :  { %845 = vst.msk [vmem:[%s1813_s1 + $0x94] sm:$0x10] %vm31_vm3, %v548_v43   ;;  %846 = vst.msk [vmem:[%s1813_s1 + $0xb3] sm:$0x20] %vm31_vm3, %v548_v43  }
  0xe1   :  { %847 = vst.msk [vmem:[%s1813_s1 + $0xd2] sm:$0x40] %vm31_vm3, %v548_v43   ;;  %848 = vst.msk [vmem:[%s1813_s1 + $0xf1] sm:$0x80] %vm31_vm3, %v548_v43  }

// kernel: _lambda_.3
= control target key start
LH: loop header
LB: loop body
LE: loop exit
PB: predicated region body
PF: predicated region fallthrough
CT: control target
= control target key end

     0   :  { %s663_s15 = smov 0   ;;  %s665_s16 = smov 0   ;;  %s768_s0 = inlined_call_operand.vmem [shape: f32[1,512], index: 0, kind: input, shape index: {}]   ;;  %s769_s1 = inlined_call_operand.vmem [shape: f32[1,512], index: 1, kind: input, shape index: {}]   ;;  %s770_s2 = inlined_call_operand.vmem [shape: f32[4,24,1], index: 2, kind: input, shape index: {}]   ;;  %s771_s3 = inlined_call_operand.vmem [shape: f32[16,24], index: 3, kind: input, shape index: {}]   ;;  %s772_s4 = inlined_call_operand.vmem [shape: f32[16,512], index: 4, kind: output, shape index: {}]  }
   0x1   :  { %s667_s17 = smov 0  }
   0x2 LB: > { %s676_s18 = sadd.s32 4294967295, %s634_s17   ;;  %s678_s19 = sadd.s32 1, %s634_s17   ;;  %s634_s17 = sphi %s667_s17, %s778_s17   ;;  %s630_s16 = sphi %s665_s16, %s777_s16   ;;  %s626_s15 = sphi %s663_s15, %s776_s15  }
   0x3   : > { %s112_s20 = ssub.s32 %s634_s17, %s678_s19  ;;  %s115_s21 = sadd.s32 1, %s630_s16 }
   0x4   : > { %p113_p0 = scmp.eq.s32.totalorder %s112_s20, 0  ;;  %p125_p1 = scmp.ne.s32.totalorder %s630_s16, %s626_s15 }
   0x5   : > { %p126_p2 = scmp.eq.s32.totalorder %s676_s18, 1  ;;  %p544_p3 = scmp.ge.s32.totalorder %s634_s17, 1 }
   0x6   : > { %s686_s22 = scalar_select %p113_p0, %s630_s16, %s115_s21  }
   0x7   : > { %p688_p4 = por %p126_p2, %p125_p1  ;;  %p172_p5 = scmp.lt.s32.totalorder %s634_s17, 3 }
   0x9   : > { %p173_p6 = pnand %p544_p3, %p172_p5 }
   0xa   : > { %v221_v0 = vld [vmem:[%s770_s2 + $0x40] sm:$0xff] (!%p173_p6)  ;;  %v219_v1 = vld [vmem:[%s770_s2 + $0x30] sm:$0xff] (!%p173_p6)  ;;  %v636_v2 = vmov (!%p173_p6), 0   ;;  %v220_v3 = vld [vmem:[%s770_s2 + $0x38] sm:$0xff] (!%p173_p6)  ;;  %v637_v13 = vmov (!%p173_p6), 0.0   ;;  %s546_s28 = sshll.u32 (!%p173_p6), %s676_s18, 1  ;;  %v241_v14 = vlaneseq (!%p173_p6) }
   0xb   : > { %176 = sbr.rel (%p173_p6) target bundleno = 396 (0x18c), region = 36  ;;  %599 = vset.pattern.permute.xlu1 (!%p173_p6), %v636_v2  ;;  %598 = vset.pattern.permute.xlu0 (!%p173_p6), %v636_v2  ;;  %v216_v4 = vld [vmem:[%s770_s2 + $0x18] sm:$0xff] (!%p173_p6)  ;;  %v217_v5 = vld [vmem:[%s770_s2 + $0x20] sm:$0xff] (!%p173_p6)  ;;  %v214_v7 = vld [vmem:[%s770_s2 + $0x8] sm:$0xff] (!%p173_p6)  ;;  %p201_p7 = scmp.lt.s32.totalorder (!%p173_p6), %s546_s28, 3  ;;  %vm363_vm7 = vcmask (!%p173_p6), 195584  }
   0xc   : > { %237 = vperm.xlu1 (!%p173_p6), %599, %v221_v0   ;;  %227 = vperm.xlu0 (!%p173_p6), %598, %v219_v1   ;;  %v213_v6 = vld [vmem:[%s770_s2] sm:$0xff] (!%p173_p6)  ;;  %v222_v8 = vld [vmem:[%s770_s2 + $0x48] sm:$0xff] (!%p173_p6)  ;;  %v223_v9 = vld [vmem:[%s770_s2 + $0x50] sm:$0xff] (!%p173_p6)  ;;  %v242_v15 = vshrl.u32 (!%p173_p6), %v241_v14, 7  ;;  %s197_s13 = sand.u32 (!%p173_p6), 1, %s626_s15  }
   0xd   : > { %v218_v10 = vld [vmem:[%s770_s2 + $0x28] sm:$0xff] (!%p173_p6)  ;;  %v224_v11 = vld [vmem:[%s770_s2 + $0x58] sm:$0xff] (!%p173_p6)  ;;  %v215_v12 = vld [vmem:[%s770_s2 + $0x10] sm:$0xff] (!%p173_p6)  ;;  %434 = vmatprep.mubr.f32.mxu0 (!%p173_p6), %v637_v13  ;;  %440 = vmatprep.mubr.f32.mxu1 (!%p173_p6), %v637_v13  ;;  %s545_s14 = sshll.u32 (!%p173_p6), %s197_s13, 5 }
   0xe   : > { %v243_v16 = vsub.s32 (!%p173_p6), 0, %v242_v15  ;;  %v247_v17 = vsub.s32 (!%p173_p6), 1, %v242_v15  ;;  %s199_s17 = scalar_lea.vmem (!%p173_p6), [#allocation2], %s545_s14 }
  0x10   : > { %232 = vperm.xlu0 (!%p173_p6), %598, %v220_v3   ;;  %277 = vperm.xlu1 (!%p173_p6), %599, %v216_v4  }
  0x12   : > { %s780_s28 = smov (!%p201_p7, %s546_s28), 3  ;;  %s561_s20 = sshll.u32 (%p688_p4), %s676_s18, 4 }
  0x13   : > { %s203_s5 = scalar_lea.vmem %s768_s0, %s780_s28  ;;  %s208_s8 = scalar_lea.vmem %s769_s1, %s780_s28 }
  0x14   : > { %282 = vperm.xlu0 %598, %v217_v5   ;;  %298 = vperm.xlu1 %599, %v213_v6   ;;  %v211_v18 = vld [vmem:[%s203_s5] sm:$0x3]  ;;  %s460_s24 = scalar_lea.vmem (%p688_p4), %s772_s4, %s561_s20 }
  0x15   : > { %v244_v19 = vrot.slane %v211_v18, %v243_v16  ;;  %v248_v20 = vrot.slane %v211_v18, %v247_v17  ;;  %v212_v47 = vld [vmem:[%s208_s8] sm:$0x3]  ;;  %v362_v18 = vld [vmem:[%s771_s3 + $0x8] sm:$0xff] }
  0x16   : > { %v325_v51 = vrot.slane %v212_v47, %v247_v17  ;;  %v321_v54 = vrot.slane %v212_v47, %v243_v16  ;;  %v361_v17 = vld [vmem:[%s771_s3] sm:$0xff] }
  0x18   : > { %303 = vperm.xlu0 %598, %v214_v7   ;;  %330 = vperm.xlu1 %599, %v222_v8  }
  0x1c   : > { %335 = vperm.xlu0 %598, %v223_v9   ;;  %287 = vperm.xlu1 %599, %v218_v10  }
  0x20   : > { %340 = vperm.xlu0 %598, %v224_v11   ;;  %308 = vperm.xlu1 %599, %v215_v12  }
  0x8b   : > { %v238_v21 = vpop.permute.xlu1 %237  ;;  %v228_v22 = vpop.permute.xlu0 %227 }
  0x8c   : > { %v256_v23 = vmul.f32 %v248_v20, %v238_v21  ;;  %v251_v24 = vmul.f32 %v244_v19, %v228_v22  ;;  %v252_v25 = vmul.f32 %v248_v20, %v228_v22  ;;  %v255_v29 = vmul.f32 %v244_v19, %v238_v21 }
  0x8e   : > { %v262_v26 = vmul.f32 %v256_v23, %v256_v23  ;;  %v257_v27 = vmul.f32 %v251_v24, %v251_v24  ;;  %v258_v28 = vmul.f32 %v252_v25, %v252_v25  ;;  %v261_v37 = vmul.f32 %v255_v29, %v255_v29 }
  0x8f   : > { %v233_v30 = vpop.permute.xlu0 %232  ;;  %v278_v31 = vpop.permute.xlu1 %277 }
  0x90   : > { %v263_v32 = vadd.f32 1.0, %v257_v27  ;;  %v264_v33 = vadd.f32 1.0, %v258_v28  ;;  %v253_v34 = vmul.f32 %v244_v19, %v233_v30  ;;  %v254_v35 = vmul.f32 %v248_v20, %v233_v30 }
  0x91   : > { %v268_v36 = vadd.f32 1.0, %v262_v26  ;;  %v267_v44 = vadd.f32 1.0, %v261_v37 }
  0x92   : > { %v259_v38 = vmul.f32 %v253_v34, %v253_v34  ;;  %v260_v39 = vmul.f32 %v254_v35, %v254_v35  ;;  %600 = vrcp.f32 %v263_v32 }
  0x93   : > { %v283_v40 = vpop.permute.xlu0 %282  ;;  %v299_v41 = vpop.permute.xlu1 %298  ;;  %602 = vrcp.f32 %v264_v33 }
  0x94   : > { %v265_v42 = vadd.f32 1.0, %v259_v38  ;;  %v266_v43 = vadd.f32 1.0, %v260_v39  ;;  %604 = vrcp.f32 %v268_v36 }
  0x96   : > { %606 = vrcp.f32 %v265_v42 }
  0x97   : > { %v304_v45 = vpop.permute.xlu0 %303  ;;  %608 = vrcp.f32 %v266_v43  ;;  %v331_v46 = vpop.permute.xlu1 %330 }
  0x98   : > { %610 = vrcp.f32 %v267_v44  ;;  %v344_v63 = vmax.f32 %v325_v51, %v331_v46  ;;  %v343_v3 = vmax.f32 %v321_v54, %v331_v46 }
  0x9a   : > { %vm350_vm2 = vcmp.gt.f32.partialorder %v344_v63, 0.0  ;;  %vm349_vm3 = vcmp.gt.f32.partialorder %v343_v3, 0.0 }
  0x9b   : > { %v336_v48 = vpop.permute.xlu0 %335  ;;  %v288_v55 = vpop.permute.xlu1 %287 }
  0x9c   : > { %v601_v49 = vpop.eup %600  ;;  %v346_v58 = vmax.f32 %v325_v51, %v336_v48  ;;  %v345_v61 = vmax.f32 %v321_v54, %v336_v48 }
  0x9d   : > { %v603_v50 = vpop.eup %602  ;;  %v290_v53 = vmul.f32 %v601_v49, %v278_v31 }
  0x9e   : > { %v605_v52 = vpop.eup %604  ;;  %v291_v57 = vmul.f32 %v603_v50, %v278_v31  ;;  %vm352_vm0 = vcmp.gt.f32.partialorder %v346_v58, 0.0  ;;  %vm739_vm1 = vcmp.gt.f32.partialorder %v345_v61, 0.0 }
  0x9f   : > { %v341_v0 = vpop.permute.xlu0 %340  ;;  %v311_v1 = vadd.f32 %v299_v41, %v290_v53  ;;  %v295_v7 = vmul.f32 %v605_v52, %v288_v55  ;;  %v309_v11 = vpop.permute.xlu1 %308  ;;  %vm563_vm4 = vmpackc.low %vm352_vm0, %vm350_vm2 }
  0xa0   : > { %v607_v56 = vpop.eup %606  ;;  %v312_v5 = vadd.f32 %v299_v41, %v291_v57  ;;  %v348_v10 = vmax.f32 %v325_v51, %v341_v0  ;;  %v347_v14 = vmax.f32 %v321_v54, %v341_v0  ;;  %vm566_vm5 = vmpackc.low %vm739_vm1, %vm349_vm3 }
  0xa1   : > { %v609_v59 = vpop.eup %608  ;;  %v292_v60 = vmul.f32 %v607_v56, %v283_v40  ;;  %v316_v15 = vadd.f32 %v309_v11, %v295_v7 }
  0xa2   : > { %v293_v62 = vmul.f32 %v609_v59, %v283_v40  ;;  %v611_v4 = vpop.eup %610  ;;  %vm354_vm6 = vcmp.gt.f32.partialorder %v348_v10, 0.0  ;;  %vm353_vm8 = vcmp.gt.f32.partialorder %v347_v14, 0.0 }
  0xa3   : > { %v313_v2 = vadd.f32 %v304_v45, %v292_v60  ;;  %v294_v13 = vmul.f32 %v611_v4, %v288_v55 }
  0xa4   : > { %v314_v6 = vadd.f32 %v304_v45, %v293_v62 }
  0xa5   : > { %v565_v8 = vpack.c.bf16 %v313_v2, %v311_v1  ;;  %v315_v16 = vadd.f32 %v309_v11, %v294_v13 }
  0xa6   : > { %v562_v12 = vpack.c.bf16 %v314_v6, %v312_v5 }
  0xa8   : > { %564 = vmatprep.subr.msk.bf16.mxu0 %vm563_vm4, %v562_v12  ;;  %568 = vmatprep.subr.msk.bf16.mxu1 %vm563_vm4, %v562_v12 }
  0xa9   : > { %567 = vmatpush1.bf16.msk.msra.mxu0 %vm566_vm5, %v565_v8  ;;  %570 = vmatpush1.bf16.msk.msra.mxu1 %vm566_vm5, %v565_v8 }
  0xaa   : > { %552 = vmatprep.subr.msk.mxu0 %vm354_vm6, %v316_v15  ;;  %569 = vmatprep.subr.msk.mxu1 %vm354_vm6, %v316_v15 }
  0xad   : > { %553 = vmatpush1.msk.msra.mxu0 %vm353_vm8, %v315_v16  ;;  %571 = vmatpush1.msk.msra.mxu1 %vm353_vm8, %v315_v16 }
  0xae   : > { %554 = vmatmul.mubr.msk.f32.vlgmr.msra.gmra.mrb[0].mxu0 %vm363_vm7, %v361_v17  ;;  %555 = vmatmul.mubr.msk.f32.vlgmr.msra.gmra.mrb[0].mxu1 %vm363_vm7, %v362_v18 }
 0x17d   : > { %457 = sbr.rel (!%p688_p4) target bundleno = 396 (0x18c), region = 40 }
 0x181   : > { %v436_v19 = vpop.f32.mrb[0].mxu0  ;;  %v442_v20 = vpop.f32.mrb[0].mxu1 }
 0x182   : > { %447 = vst [vmem:[%s199_s17] sm:$0xff] %v436_v19  ;;  %449 = vst [vmem:[%s199_s17 + $0x10] sm:$0xff] %v442_v20  ;;  %v438_v21 = vpop.f32.mrb[1].mxu0  ;;  %v444_v22 = vpop.f32.mrb[1].mxu1 }
 0x183   : > { %448 = vst [vmem:[%s199_s17 + $0x8] sm:$0xff] %v438_v21  ;;  %450 = vst [vmem:[%s199_s17 + $0x18] sm:$0xff] %v444_v22 }
 0x189   : > { %v473_v23 = vld [vmem:[%s199_s17] sm:$0xff]  ;;  %v477_v25 = vld [vmem:[%s199_s17 + $0x10] sm:$0xff] }
 0x18a   : > { %v475_v24 = vld [vmem:[%s199_s17 + $0x8] sm:$0xff]  ;;  %v479_v26 = vld [vmem:[%s199_s17 + $0x18] sm:$0xff]  ;;  %474 = vst [vmem:[%s460_s24] sm:$0xff] %v473_v23  ;;  %478 = vst [vmem:[%s460_s24 + $0x20] sm:$0xff] %v477_v25 }
 0x18b   : > { %476 = vst [vmem:[%s460_s24 + $0x8] sm:$0xff] %v475_v24  ;;  %480 = vst [vmem:[%s460_s24 + $0x28] sm:$0xff] %v479_v26 }
 0x18c PF: > { %p11_p8 = scmp.ge.s32.totalorder %s678_s19, 4   ;;  %s776_s15 = smov %s630_s16 }
 0x18d   : > { %s777_s16 = smov %s686_s22  ;;  %s778_s17 = smov %s678_s19 }
 0x18e   :  { %13 = sbr.rel (!%p11_p8) target bundleno = 2 (0x2), region = 92 }

// kernel: _lambda_.2
= control target key start
LH: loop header
LB: loop body
LE: loop exit
PB: predicated region body
PF: predicated region fallthrough
CT: control target
= control target key end

     0   :  { %s679_s15 = smov 0   ;;  %s681_s16 = smov 0   ;;  %s790_s0 = inlined_call_operand.vmem [shape: f32[1,512], index: 0, kind: input, shape index: {}]   ;;  %s791_s1 = inlined_call_operand.vmem [shape: f32[1,512], index: 1, kind: input, shape index: {}]   ;;  %s792_s2 = inlined_call_operand.vmem [shape: f32[4,24,1], index: 2, kind: input, shape index: {}]   ;;  %s793_s3 = inlined_call_operand.vmem [shape: f32[24,24], index: 3, kind: input, shape index: {}]   ;;  %s794_s4 = inlined_call_operand.vmem [shape: f32[24,512], index: 4, kind: output, shape index: {}]  }
   0x1   :  { %s683_s17 = smov 0  }
   0x2 LB: > { %s692_s18 = sadd.s32 4294967295, %s650_s17   ;;  %s694_s19 = sadd.s32 1, %s650_s17   ;;  %s650_s17 = sphi %s683_s17, %s800_s17   ;;  %s646_s16 = sphi %s681_s16, %s799_s16   ;;  %s642_s15 = sphi %s679_s15, %s798_s15  }
   0x3   : > { %s112_s20 = ssub.s32 %s650_s17, %s694_s19  ;;  %s115_s21 = sadd.s32 1, %s646_s16 }
   0x4   : > { %p113_p0 = scmp.eq.s32.totalorder %s112_s20, 0  ;;  %p125_p1 = scmp.ne.s32.totalorder %s646_s16, %s642_s15 }
   0x5   : > { %p126_p2 = scmp.eq.s32.totalorder %s692_s18, 1  ;;  %p560_p3 = scmp.ge.s32.totalorder %s650_s17, 1 }
   0x6   : > { %s702_s22 = scalar_select %p113_p0, %s646_s16, %s115_s21  }
   0x7   : > { %p704_p4 = por %p126_p2, %p125_p1  ;;  %p172_p5 = scmp.lt.s32.totalorder %s650_s17, 3 }
   0x9   : > { %p173_p6 = pnand %p560_p3, %p172_p5 }
   0xa   : > { %v221_v0 = vld [vmem:[%s792_s2 + $0x40] sm:$0xff] (!%p173_p6)  ;;  %v219_v1 = vld [vmem:[%s792_s2 + $0x30] sm:$0xff] (!%p173_p6)  ;;  %v652_v2 = vmov (!%p173_p6), 0   ;;  %v220_v3 = vld [vmem:[%s792_s2 + $0x38] sm:$0xff] (!%p173_p6)  ;;  %v653_v13 = vmov (!%p173_p6), 0.0   ;;  %s561_s28 = sshll.u32 (!%p173_p6), %s692_s18, 1  ;;  %v241_v14 = vlaneseq (!%p173_p6) }
   0xb   : > { %176 = sbr.rel (%p173_p6) target bundleno = 400 (0x190), region = 36  ;;  %615 = vset.pattern.permute.xlu1 (!%p173_p6), %v652_v2  ;;  %614 = vset.pattern.permute.xlu0 (!%p173_p6), %v652_v2  ;;  %v216_v4 = vld [vmem:[%s792_s2 + $0x18] sm:$0xff] (!%p173_p6)  ;;  %v217_v5 = vld [vmem:[%s792_s2 + $0x20] sm:$0xff] (!%p173_p6)  ;;  %v214_v7 = vld [vmem:[%s792_s2 + $0x8] sm:$0xff] (!%p173_p6)  ;;  %p201_p7 = scmp.lt.s32.totalorder (!%p173_p6), %s561_s28, 3  ;;  %vm364_vm7 = vcmask (!%p173_p6), 195584  }
   0xc   : > { %237 = vperm.xlu1 (!%p173_p6), %615, %v221_v0   ;;  %227 = vperm.xlu0 (!%p173_p6), %614, %v219_v1   ;;  %v213_v6 = vld [vmem:[%s792_s2] sm:$0xff] (!%p173_p6)  ;;  %v222_v8 = vld [vmem:[%s792_s2 + $0x48] sm:$0xff] (!%p173_p6)  ;;  %v223_v9 = vld [vmem:[%s792_s2 + $0x50] sm:$0xff] (!%p173_p6)  ;;  %v242_v15 = vshrl.u32 (!%p173_p6), %v241_v14, 7  ;;  %s197_s17 = sand.u32 (!%p173_p6), 1, %s642_s15  }
   0xd   : > { %v218_v10 = vld [vmem:[%s792_s2 + $0x28] sm:$0xff] (!%p173_p6)  ;;  %v224_v11 = vld [vmem:[%s792_s2 + $0x58] sm:$0xff] (!%p173_p6)  ;;  %v215_v12 = vld [vmem:[%s792_s2 + $0x10] sm:$0xff] (!%p173_p6)  ;;  %444 = vmatprep.mubr.f32.mxu1 (!%p173_p6), %v653_v13  ;;  %438 = vmatprep.mubr.f32.mxu0 (!%p173_p6), %v653_v13  ;;  %s587_s20 = smul.u32 (!%p173_p6), 48, %s197_s17 }
   0xe   : > { %v243_v16 = vsub.s32 (!%p173_p6), 0, %v242_v15  ;;  %v247_v17 = vsub.s32 (!%p173_p6), 1, %v242_v15 }
   0xf   : > { %s199_s21 = scalar_lea.vmem (!%p173_p6), [#allocation2], %s587_s20 }
  0x10   : > { %232 = vperm.xlu0 (!%p173_p6), %614, %v220_v3   ;;  %277 = vperm.xlu1 (!%p173_p6), %615, %v216_v4  }
  0x12   : > { %s802_s28 = smov (!%p201_p7, %s561_s28), 3  ;;  %s576_s24 = sshll.u32 (%p704_p4), %s692_s18, 4 }
  0x13   : > { %s203_s5 = scalar_lea.vmem %s790_s0, %s802_s28  ;;  %s208_s8 = scalar_lea.vmem %s791_s1, %s802_s28 }
  0x14   : > { %282 = vperm.xlu0 %614, %v217_v5   ;;  %298 = vperm.xlu1 %615, %v213_v6   ;;  %v211_v18 = vld [vmem:[%s203_s5] sm:$0x3]  ;;  %s472_s26 = scalar_lea.vmem (%p704_p4), %s794_s4, %s576_s24 }
  0x15   : > { %v244_v19 = vrot.slane %v211_v18, %v243_v16  ;;  %v248_v20 = vrot.slane %v211_v18, %v247_v17  ;;  %v212_v47 = vld [vmem:[%s208_s8] sm:$0x3]  ;;  %v362_v18 = vld [vmem:[%s793_s3 + $0x8] sm:$0xff] }
  0x16   : > { %v325_v51 = vrot.slane %v212_v47, %v247_v17  ;;  %v321_v54 = vrot.slane %v212_v47, %v243_v16 }
  0x18   : > { %303 = vperm.xlu0 %614, %v214_v7   ;;  %330 = vperm.xlu1 %615, %v222_v8  }
  0x1c   : > { %335 = vperm.xlu0 %614, %v223_v9   ;;  %287 = vperm.xlu1 %615, %v218_v10  }
  0x20   : > { %340 = vperm.xlu0 %614, %v224_v11   ;;  %308 = vperm.xlu1 %615, %v215_v12  }
  0x8b   : > { %v238_v21 = vpop.permute.xlu1 %237  ;;  %v228_v22 = vpop.permute.xlu0 %227 }
  0x8c   : > { %v256_v23 = vmul.f32 %v248_v20, %v238_v21  ;;  %v251_v24 = vmul.f32 %v244_v19, %v228_v22  ;;  %v252_v25 = vmul.f32 %v248_v20, %v228_v22  ;;  %v255_v29 = vmul.f32 %v244_v19, %v238_v21 }
  0x8e   : > { %v262_v26 = vmul.f32 %v256_v23, %v256_v23  ;;  %v257_v27 = vmul.f32 %v251_v24, %v251_v24  ;;  %v258_v28 = vmul.f32 %v252_v25, %v252_v25  ;;  %v261_v37 = vmul.f32 %v255_v29, %v255_v29 }
  0x8f   : > { %v233_v30 = vpop.permute.xlu0 %232  ;;  %v278_v31 = vpop.permute.xlu1 %277 }
  0x90   : > { %v263_v32 = vadd.f32 1.0, %v257_v27  ;;  %v264_v33 = vadd.f32 1.0, %v258_v28  ;;  %v253_v34 = vmul.f32 %v244_v19, %v233_v30  ;;  %v254_v35 = vmul.f32 %v248_v20, %v233_v30  ;;  %v361_v19 = vld [vmem:[%s793_s3] sm:$0xff]  ;;  %v363_v20 = vld [vmem:[%s793_s3 + $0x10] sm:$0xff] }
  0x91   : > { %v268_v36 = vadd.f32 1.0, %v262_v26  ;;  %v267_v44 = vadd.f32 1.0, %v261_v37 }
  0x92   : > { %v259_v38 = vmul.f32 %v253_v34, %v253_v34  ;;  %v260_v39 = vmul.f32 %v254_v35, %v254_v35  ;;  %616 = vrcp.f32 %v263_v32 }
  0x93   : > { %v283_v40 = vpop.permute.xlu0 %282  ;;  %v299_v41 = vpop.permute.xlu1 %298  ;;  %618 = vrcp.f32 %v264_v33 }
  0x94   : > { %v265_v42 = vadd.f32 1.0, %v259_v38  ;;  %v266_v43 = vadd.f32 1.0, %v260_v39  ;;  %620 = vrcp.f32 %v268_v36 }
  0x96   : > { %622 = vrcp.f32 %v265_v42 }
  0x97   : > { %v304_v45 = vpop.permute.xlu0 %303  ;;  %624 = vrcp.f32 %v266_v43  ;;  %v331_v46 = vpop.permute.xlu1 %330 }
  0x98   : > { %626 = vrcp.f32 %v267_v44  ;;  %v344_v63 = vmax.f32 %v325_v51, %v331_v46  ;;  %v343_v3 = vmax.f32 %v321_v54, %v331_v46 }
  0x9a   : > { %vm350_vm2 = vcmp.gt.f32.partialorder %v344_v63, 0.0  ;;  %vm349_vm3 = vcmp.gt.f32.partialorder %v343_v3, 0.0 }
  0x9b   : > { %v336_v48 = vpop.permute.xlu0 %335  ;;  %v288_v55 = vpop.permute.xlu1 %287 }
  0x9c   : > { %v617_v49 = vpop.eup %616  ;;  %v346_v58 = vmax.f32 %v325_v51, %v336_v48  ;;  %v345_v61 = vmax.f32 %v321_v54, %v336_v48 }
  0x9d   : > { %v619_v50 = vpop.eup %618  ;;  %v290_v53 = vmul.f32 %v617_v49, %v278_v31 }
  0x9e   : > { %v621_v52 = vpop.eup %620  ;;  %v291_v57 = vmul.f32 %v619_v50, %v278_v31  ;;  %vm352_vm0 = vcmp.gt.f32.partialorder %v346_v58, 0.0  ;;  %vm757_vm1 = vcmp.gt.f32.partialorder %v345_v61, 0.0 }
  0x9f   : > { %v341_v0 = vpop.permute.xlu0 %340  ;;  %v311_v1 = vadd.f32 %v299_v41, %v290_v53  ;;  %v295_v7 = vmul.f32 %v621_v52, %v288_v55  ;;  %v309_v11 = vpop.permute.xlu1 %308  ;;  %vm578_vm4 = vmpackc.low %vm352_vm0, %vm350_vm2 }
  0xa0   : > { %v623_v56 = vpop.eup %622  ;;  %v312_v5 = vadd.f32 %v299_v41, %v291_v57  ;;  %v348_v10 = vmax.f32 %v325_v51, %v341_v0  ;;  %v347_v15 = vmax.f32 %v321_v54, %v341_v0  ;;  %vm581_vm5 = vmpackc.low %vm757_vm1, %vm349_vm3 }
  0xa1   : > { %v625_v59 = vpop.eup %624  ;;  %v292_v60 = vmul.f32 %v623_v56, %v283_v40  ;;  %v316_v16 = vadd.f32 %v309_v11, %v295_v7 }
  0xa2   : > { %v293_v62 = vmul.f32 %v625_v59, %v283_v40  ;;  %v627_v4 = vpop.eup %626  ;;  %vm354_vm6 = vcmp.gt.f32.partialorder %v348_v10, 0.0  ;;  %vm353_vm8 = vcmp.gt.f32.partialorder %v347_v15, 0.0 }
  0xa3   : > { %v313_v2 = vadd.f32 %v304_v45, %v292_v60  ;;  %v294_v14 = vmul.f32 %v627_v4, %v288_v55 }
  0xa4   : > { %v314_v6 = vadd.f32 %v304_v45, %v293_v62 }
  0xa5   : > { %v580_v8 = vpack.c.bf16 %v313_v2, %v311_v1  ;;  %v315_v17 = vadd.f32 %v309_v11, %v294_v14 }
  0xa6   : > { %v577_v12 = vpack.c.bf16 %v314_v6, %v312_v5 }
  0xa8   : > { %579 = vmatprep.subr.msk.bf16.mxu0 %vm578_vm4, %v577_v12  ;;  %583 = vmatprep.subr.msk.bf16.mxu1 %vm578_vm4, %v577_v12 }
  0xa9   : > { %582 = vmatpush1.bf16.msk.msra.mxu0 %vm581_vm5, %v580_v8  ;;  %585 = vmatpush1.bf16.msk.msra.mxu1 %vm581_vm5, %v580_v8 }
  0xaa   : > { %567 = vmatprep.subr.msk.mxu0 %vm354_vm6, %v316_v16  ;;  %584 = vmatprep.subr.msk.mxu1 %vm354_vm6, %v316_v16 }
  0xad   : > { %568 = vmatpush1.msk.msra.mxu0 %vm353_vm8, %v315_v17  ;;  %586 = vmatpush1.msk.msra.mxu1 %vm353_vm8, %v315_v17 }
  0xae   : > { %570 = vmatmul.mubr.msk.f32.vlgmr.msra.gmra.mrb[0].mxu1 %vm364_vm7, %v362_v18  ;;  %569 = vmatmul.mubr.msk.f32.vlgmr.msra.gmra.mrb[0].mxu0 %vm364_vm7, %v361_v19 }
  0xaf   : > { %450 = vmatprep.mubr.f32.mxu1 %v653_v13 }
  0xb2   : > { %571 = vmatmul.mubr.msk.f32.gmra.mrb[2].mxu1 %vm364_vm7, %v363_v20 }
 0x181   : > { %v446_v21 = vpop.f32.mrb[0].mxu1  ;;  %v440_v22 = vpop.f32.mrb[0].mxu0  ;;  %469 = sbr.rel (!%p704_p4) target bundleno = 400 (0x190), region = 40 }
 0x182   : > { %459 = vst [vmem:[%s199_s21 + $0x10] sm:$0xff] %v446_v21  ;;  %v448_v23 = vpop.f32.mrb[1].mxu1  ;;  %457 = vst [vmem:[%s199_s21] sm:$0xff] %v440_v22  ;;  %v442_v24 = vpop.f32.mrb[1].mxu0 }
 0x183   : > { %460 = vst [vmem:[%s199_s21 + $0x18] sm:$0xff] %v448_v23  ;;  %458 = vst [vmem:[%s199_s21 + $0x8] sm:$0xff] %v442_v24 }
 0x185   : > { %v452_v25 = vpop.f32.mrb[2].mxu1 }
 0x186   : > { %461 = vst [vmem:[%s199_s21 + $0x20] sm:$0xff] %v452_v25  ;;  %v454_v26 = vpop.f32.mrb[3].mxu1 }
 0x187   : > { %462 = vst [vmem:[%s199_s21 + $0x28] sm:$0xff] %v454_v26 }
 0x189   : > { %v485_v13 = vld [vmem:[%s199_s21] sm:$0xff]  ;;  %v489_v28 = vld [vmem:[%s199_s21 + $0x10] sm:$0xff] }
 0x18a   : > { %v487_v27 = vld [vmem:[%s199_s21 + $0x8] sm:$0xff]  ;;  %v491_v29 = vld [vmem:[%s199_s21 + $0x18] sm:$0xff]  ;;  %486 = vst [vmem:[%s472_s26] sm:$0xff] %v485_v13  ;;  %490 = vst [vmem:[%s472_s26 + $0x20] sm:$0xff] %v489_v28 }
 0x18b   : > { %488 = vst [vmem:[%s472_s26 + $0x8] sm:$0xff] %v487_v27  ;;  %492 = vst [vmem:[%s472_s26 + $0x28] sm:$0xff] %v491_v29 }
 0x18d   : > { %v493_v30 = vld [vmem:[%s199_s21 + $0x20] sm:$0xff] }
 0x18e   : > { %v495_v31 = vld [vmem:[%s199_s21 + $0x28] sm:$0xff]  ;;  %494 = vst [vmem:[%s472_s26 + $0x40] sm:$0xff] %v493_v30 }
 0x18f   : > { %496 = vst [vmem:[%s472_s26 + $0x48] sm:$0xff] %v495_v31 }
 0x190 PF: > { %p11_p8 = scmp.ge.s32.totalorder %s694_s19, 4   ;;  %s798_s15 = smov %s646_s16 }
 0x191   : > { %s799_s16 = smov %s702_s22  ;;  %s800_s17 = smov %s694_s19 }
 0x192   :  { %13 = sbr.rel (!%p11_p8) target bundleno = 2 (0x2), region = 92 }

</bundles_post_ra>
